<compile_context>
chip_gen: v6e
topology: v6e:2x2x1
jax: 0.10.0
libtpu: 0.0.40
codegen_flags: <defaults>
</compile_context>

<pallas_src>
import jax
import jax.numpy as jnp
from jax import lax
from jax.experimental import pallas as pl
from jax.experimental.pallas import tpu as pltpu

# ------------------------- configuration (small toy shapes) -------------------
B, S, H = 2, 8, 32
LAYERS = 3
EPSILON = 0.01
THRESHOLD = 1.0 - EPSILON
ACT_COMMITMENT_COST = 0.001
LAYER_PENALTY = 0.001
LN_EPS = 1e-5
_NEG_INF = -1e30  # finite mask value (avoids 0 * inf = nan)

_VMEM = pl.BlockSpec(memory_space=pltpu.MemorySpace.VMEM)


# ----------------------------- fused ACTBlock kernel --------------------------
def _act_block_kernel(x_ref, p32_ref, whalt_ref, tok_ref, out_ref, stats_ref,
                      layer_sc):
    N, Hk = x_ref.shape
    f32 = jnp.float32
    n_layers_f = float(LAYERS)

    # ---- load everything once; it stays VMEM/vreg resident for the forward ----
    h = x_ref[...]                                   # (N, H) hidden state
    p32 = p32_ref[...]                               # packed (3H+3+LAYERS, H) slab
    blk_w1 = p32[0 * Hk:1 * Hk, :]
    blk_w2 = p32[1 * Hk:2 * Hk, :]
    proj_w = p32[2 * Hk:3 * Hk, :]
    blk_b1 = p32[3 * Hk + 0:3 * Hk + 1, :]
    blk_b2 = p32[3 * Hk + 1:3 * Hk + 2, :]
    proj_b = p32[3 * Hk + 2:3 * Hk + 3, :]
    wle = p32[3 * Hk + 3:3 * Hk + 3 + LAYERS, :]     # (LAYERS, H)

    w_halt = whalt_ref[...]                          # (H, 4): folded halting weights
    tok = tok_ref[...]                               # (N, N+3) token-side constants
    avg_mat = tok[:, 0:N]                            # (N, N) per-batch mean operator
    halt_bias = tok[:, N:N + 1]                      # (N, 1) folded halting bias
    m_prev = tok[:, N + 1:N + 2]                     # (N, 1) 0 where s == 0
    m_next = tok[:, N + 2:N + 3]                     # (N, 1) 0 where s == S-1

    def halting_prob(hx):
        """ACTLinearHaltingFunction with LN-affine/conv/fc heads pre-folded."""
        mu = jnp.mean(hx, axis=-1, keepdims=True)
        var = jnp.mean((hx - mu) ** 2, axis=-1, keepdims=True)
        xn = (hx - mu) * lax.rsqrt(var + LN_EPS)                 # shared LN stats
        taps = jnp.dot(xn, w_halt, preferred_element_type=f32)   # (N, 4)
        a = taps[:, 0:1]      # prev-tap projection
        b = taps[:, 1:2]      # center-tap projection
        c = taps[:, 2:3]      # next-tap projection
        g = taps[:, 3:4]      # global-branch projection
        halt_local = (m_prev * jnp.roll(a, 1, axis=0) + b
                      + m_next * jnp.roll(c, -1, axis=0))        # (N, 1)
        halt_global = jnp.dot(avg_mat, g, preferred_element_type=f32)  # (N, 1)
        return jax.nn.sigmoid(halt_local + halt_global + halt_bias)    # (N, 1)

    def block_fn(hx):
        """Synthetic transformer block (residual MLP); stands in for user block."""
        z = jnp.tanh(jnp.dot(hx, blk_w1, preferred_element_type=f32) + blk_b1)
        return hx + jnp.dot(z, blk_w2, preferred_element_type=f32) + blk_b2

    # ----------------------- fixed-trip, gated ACT loop ------------------------
    hp = jnp.zeros((N, 1), f32)          # halting_probability
    rem = jnp.zeros((N, 1), f32)         # remainders
    nup = jnp.zeros((N, 1), f32)         # n_updates
    step_count = jnp.zeros((1, 1), f32)  # number of executed while-loop steps
    valids = []

    for t in range(LAYERS):
        # while ((hp < threshold) & (n_updates < layers)).any()  -> (1,1) run flag
        cond = jnp.where((hp < THRESHOLD) & (nup < n_layers_f), 1.0, 0.0)
        run = jnp.max(cond, axis=0, keepdims=True)               # (1,1)
        run_b = run > 0.5                                        # (1,1) bool

        h_in = h + wle[t:t + 1, :]                               # layer embedding add
        prob = halting_prob(h_in)                                # (N,1)
        h_new = block_fn(h_in)                                   # (N,H)

        # ACT bookkeeping (same op order as the PyTorch reference).
        still = jnp.where(hp < 1.0, 1.0, 0.0)
        acc = hp + prob * still
        new_halted = jnp.where(acc > THRESHOLD, still, 0.0)
        still = jnp.where(acc <= THRESHOLD, still, 0.0)
        hp_n = hp + prob * still
        rem_n = rem + new_halted * (1.0 - hp_n)
        hp_n = hp_n + new_halted * rem_n
        nup_n = nup + still + new_halted
        # NOTE: previous_state / update_weights are dead on the 'simple'
        # layerwise_attn path of the reference (never returned) -> not computed.

        # Freeze all state once every token has halted (matches eager while-exit).
        h = jnp.where(run_b, h_new, h)
        hp = jnp.where(run_b, hp_n, hp)
        rem = jnp.where(run_b, rem_n, rem)
        nup = jnp.where(run_b, nup_n, nup)
        step_count = step_count + run

        layer_sc[t] = h_new          # VMEM-resident layer output (masked if !run)
        valids.append(run_b)

    # ------------- layerwise 'simple' attention: online softmax ----------------
    proj = jnp.dot(h, proj_w, preferred_element_type=f32) + proj_b   # (N,H)
    m_run = jnp.full((N, 1), _NEG_INF, f32)
    denom = jnp.zeros((N, 1), f32)
    acc_o = jnp.zeros((N, Hk), f32)
    for t in range(LAYERS):
        lo = layer_sc[t]                                              # (N,H)
        s_t = jnp.sum(proj * lo, axis=-1, keepdims=True)              # (N,1)
        s_t = jnp.where(valids[t], s_t, _NEG_INF)                     # mask skipped
        m_new = jnp.maximum(m_run, s_t)
        alpha = jnp.exp(m_run - m_new)
        pr = jnp.where(valids[t], jnp.exp(s_t - m_new), 0.0)
        denom = alpha * denom + pr
        acc_o = alpha * acc_o + pr * lo
        m_run = m_new
    weighted = acc_o * pl.reciprocal(denom, approx=True)              # EUP recip

    # ------------------------ lane-dense output writeback ----------------------
    # (N,H) with H=32 < 128 would be masked partial stores; repack into 128-lane
    # rows.  At real sizes (H multiple of 128) this repack disappears.
    per_row = 128 // Hk
    n_rows = (N * Hk) // 128
    rows = []
    for r in range(n_rows):
        pieces = [weighted[r * per_row + j:r * per_row + j + 1, :]
                  for j in range(per_row)]
        rows.append(jnp.concatenate(pieces, axis=1))
    out_ref[...] = jnp.concatenate(rows, axis=0)

    # ------------------------------ loss scalars -------------------------------
    # act_loss = cost * sum_S( sum_B(p_t) / B / B )  (double /B matches the
    # reference: p_t_size == p_t.shape[0] == B for a 3-D hidden state).
    p_t_sum = jnp.sum(rem + nup, axis=0, keepdims=True)               # (1,1)
    act_loss = ACT_COMMITMENT_COST * p_t_sum / float(B * B)
    rem_mean = jnp.sum(rem, axis=0, keepdims=True) / float(N)
    ponder = -LAYER_PENALTY * (step_count + rem_mean)                 # (1,1)

    lane = lax.broadcasted_iota(jnp.int32, (1, 128), 1)
    stats_ref[...] = jnp.where(lane == 0, act_loss,
                               jnp.where(lane == 1, ponder, 0.0))


# ------------------------------- host wrapper ----------------------------------
def act_block_forward(hidden_states, p):
    Bx, Sx, Hx = hidden_states.shape
    N = Bx * Sx
    assert 128 % Hx == 0 and (N * Hx) % 128 == 0

    f32 = jnp.float32

    # ---- fold LayerNorm affine + Conv1d taps + fc heads of the halting fn ----
    lcw = p["l_conv_w"]                       # (3H,H) rows [Wk0^T; Wk1^T; Wk2^T]
    lfc = p["l_fc_w"][0]                      # (H,)
    v0 = lcw[0 * Hx:1 * Hx] @ lfc             # (H,) per-tap fused conv*fc
    v1 = lcw[1 * Hx:2 * Hx] @ lfc
    v2 = lcw[2 * Hx:3 * Hx] @ lfc
    gl, bl = p["l_ln_g"][0], p["l_ln_b"][0]
    u0, u1, u2 = gl * v0, gl * v1, gl * v2    # fold LN gamma
    d0, d1, d2 = bl @ v0, bl @ v1, bl @ v2    # fold LN beta (scalars)
    cb = p["l_conv_b"][0] @ lfc + p["l_fc_b"][0, 0]

    gfc = p["g_fc_w"][0]
    vg = p["g_conv_w"] @ gfc                  # (H,)
    gg, bg = p["g_ln_g"][0], p["g_ln_b"][0]
    ug = gg * vg
    dg = bg @ vg
    cbg = p["g_conv_b"][0] @ gfc + p["g_fc_b"][0, 0]

    w_halt = jnp.stack([u0, u1, u2, ug], axis=1).astype(f32)          # (H, 4)

    # ---- layer-invariant token-side constants ----------------------------------
    s_pos = jnp.arange(N) % Sx
    m_prev = (s_pos != 0).astype(f32)                                 # zero-pad edge
    m_next = (s_pos != Sx - 1).astype(f32)
    halt_bias = m_prev * d0 + d1 + m_next * d2 + cb + dg + cbg        # (N,)
    avg_mat = jnp.kron(jnp.eye(Bx, dtype=f32),
                       jnp.full((Sx, Sx), 1.0 / Sx, f32))             # (N,N)
    tok_slab = jnp.concatenate(
        [avg_mat, halt_bias[:, None], m_prev[:, None], m_next[:, None]],
        axis=1).astype(f32)                                           # (N, N+3)

    # ---- pack the remaining weights into one slab (one DMA instead of many) ----
    p32 = jnp.concatenate(
        [p["blk_w1"], p["blk_w2"], p["proj_w"],
         p["blk_b1"], p["blk_b2"], p["proj_b"], p["wle"]],
        axis=0).astype(f32)                                           # (3H+3+L, H)

    x2d = hidden_states.reshape(N, Hx).astype(f32)

    out_flat, stats = pl.pallas_call(
        _act_block_kernel,
        out_shape=(
            jax.ShapeDtypeStruct(((N * Hx) // 128, 128), f32),  # lane-dense output
            jax.ShapeDtypeStruct((1, 128), f32),                # lane-dense stats
        ),
        in_specs=[_VMEM] * 4,
        out_specs=(_VMEM, _VMEM),
        scratch_shapes=[pltpu.VMEM((LAYERS, N, Hx), f32)],      # layer outputs
    )(x2d, p32, w_halt, tok_slab)

    weighted = out_flat.reshape(Bx, Sx, Hx)
    act_loss = stats[0, 0]
    ponder_cost = stats[0, 1]

    presents = None
    all_hidden_states = None
    all_self_attentions = None
    all_cross_attentions = None
    # TODO(synk): use_cache / output_attentions / head_mask / past_key_values /
    # gradient checkpointing / DynamicBlock / 'mha'-style layerwise_attn paths are
    # not exercised (all default to None/False in this forward).
    return [weighted, presents, all_hidden_states, all_self_attentions,
            all_cross_attentions, act_loss, ponder_cost]


# ------------------------------- parameter init ---------------------------------
def init_params(key):
    ks = jax.random.split(key, 10)
    s = 0.1
    p = {}
    p["wle"] = jax.random.normal(ks[0], (LAYERS, H), jnp.float32) * s
    # ACTLinearHaltingFunction params.
    p["l_ln_g"] = jnp.ones((1, H), jnp.float32)
    p["l_ln_b"] = jnp.zeros((1, H), jnp.float32)
    # Local Conv1d weights pre-packed tap-major as (3H, H): rows [w_k0; w_k1; w_k2],
    # each block (C_in, C_out), i.e. the transposed per-tap Conv1d weight.
    p["l_conv_w"] = jax.random.normal(ks[1], (3 * H, H), jnp.float32) * (1.0 / (3 * H) ** 0.5)
    p["l_conv_b"] = jnp.full((1, H), -3.0, jnp.float32)   # local_bias_init = -3.0
    p["l_fc_w"] = jax.random.normal(ks[2], (1, H), jnp.float32) * (1.0 / H ** 0.5)
    p["l_fc_b"] = jnp.zeros((1, 1), jnp.float32)
    p["g_ln_g"] = jnp.ones((1, H), jnp.float32)
    p["g_ln_b"] = jnp.zeros((1, H), jnp.float32)
    p["g_conv_w"] = jax.random.normal(ks[3], (H, H), jnp.float32) * (1.0 / H ** 0.5)
    p["g_conv_b"] = jax.random.normal(ks[4], (1, H), jnp.float32) * s
    p["g_fc_w"] = jax.random.normal(ks[5], (1, H), jnp.float32) * (1.0 / H ** 0.5)
    p["g_fc_b"] = jnp.zeros((1, 1), jnp.float32)
    # Synthetic transformer block (residual MLP).
    p["blk_w1"] = jax.random.normal(ks[6], (H, H), jnp.float32) * s
    p["blk_b1"] = jnp.zeros((1, H), jnp.float32)
    p["blk_w2"] = jax.random.normal(ks[7], (H, H), jnp.float32) * s
    p["blk_b2"] = jnp.zeros((1, H), jnp.float32)
    # Layerwise 'simple' attention projection.
    p["proj_w"] = jax.random.normal(ks[8], (H, H), jnp.float32) * (1.0 / H ** 0.5)
    p["proj_b"] = jnp.zeros((1, H), jnp.float32)
    return p


if __name__ == "__main__":
    key = jax.random.PRNGKey(0)
    k_param, k_x = jax.random.split(key)
    params = init_params(k_param)
    x = jax.random.normal(k_x, (B, S, H), jnp.float32)

    forward = jax.jit(act_block_forward)
    outputs = forward(x, params)
    weighted, _, _, _, _, act_loss, ponder_cost = outputs

    jax.block_until_ready(weighted)
    jax.block_until_ready(act_loss)
    jax.block_until_ready(ponder_cost)

    assert weighted.shape == (B, S, H)
    assert act_loss.shape == () and ponder_cost.shape == ()
    assert bool(jnp.isfinite(weighted).all())
    print("KERNEL_OK")
</pallas_src>

<mosaic_0001>
module attributes {stable_mosaic.version = 11 : i64} {
  func.func @_act_block_kernel(%arg0: memref<16x32xf32, #tpu.memory_space<vmem>>, %arg1: memref<102x32xf32, #tpu.memory_space<vmem>>, %arg2: memref<32x4xf32, #tpu.memory_space<vmem>>, %arg3: memref<16x19xf32, #tpu.memory_space<vmem>>, %arg4: memref<4x128xf32, #tpu.memory_space<vmem>>, %arg5: memref<1x128xf32, #tpu.memory_space<vmem>>, %arg6: memref<3x16x32xf32, #tpu.memory_space<vmem>>) attributes {dimension_semantics = [], scalar_prefetch = 0 : i64, scratch_operands = 1 : i64, tpu.core_type = #tpu.core_type<tc>} {
    %c0 = arith.constant 0 : index
    %c0_0 = arith.constant 0 : index
    %0 = vector.load %arg0[%c0, %c0_0] : memref<16x32xf32, #tpu.memory_space<vmem>>, vector<16x32xf32>
    %c0_1 = arith.constant 0 : index
    %c0_2 = arith.constant 0 : index
    %1 = vector.load %arg1[%c0_1, %c0_2] : memref<102x32xf32, #tpu.memory_space<vmem>>, vector<102x32xf32>
    %2 = vector.extract_strided_slice %1 {offsets = [0, 0], sizes = [32, 32], strides = [1, 1]} : vector<102x32xf32> to vector<32x32xf32>
    %3 = vector.extract_strided_slice %1 {offsets = [32, 0], sizes = [32, 32], strides = [1, 1]} : vector<102x32xf32> to vector<32x32xf32>
    %4 = vector.extract_strided_slice %1 {offsets = [64, 0], sizes = [32, 32], strides = [1, 1]} : vector<102x32xf32> to vector<32x32xf32>
    %5 = vector.extract_strided_slice %1 {offsets = [96, 0], sizes = [1, 32], strides = [1, 1]} : vector<102x32xf32> to vector<1x32xf32>
    %6 = vector.extract_strided_slice %1 {offsets = [97, 0], sizes = [1, 32], strides = [1, 1]} : vector<102x32xf32> to vector<1x32xf32>
    %7 = vector.extract_strided_slice %1 {offsets = [98, 0], sizes = [1, 32], strides = [1, 1]} : vector<102x32xf32> to vector<1x32xf32>
    %8 = vector.extract_strided_slice %1 {offsets = [99, 0], sizes = [3, 32], strides = [1, 1]} : vector<102x32xf32> to vector<3x32xf32>
    %c0_3 = arith.constant 0 : index
    %c0_4 = arith.constant 0 : index
    %9 = vector.load %arg2[%c0_3, %c0_4] : memref<32x4xf32, #tpu.memory_space<vmem>>, vector<32x4xf32>
    %c0_5 = arith.constant 0 : index
    %c0_6 = arith.constant 0 : index
    %10 = vector.load %arg3[%c0_5, %c0_6] : memref<16x19xf32, #tpu.memory_space<vmem>>, vector<16x19xf32>
    %11 = vector.extract_strided_slice %10 {offsets = [0, 0], sizes = [16, 16], strides = [1, 1]} : vector<16x19xf32> to vector<16x16xf32>
    %12 = vector.extract_strided_slice %10 {offsets = [0, 16], sizes = [16, 1], strides = [1, 1]} : vector<16x19xf32> to vector<16x1xf32>
    %13 = vector.extract_strided_slice %10 {offsets = [0, 17], sizes = [16, 1], strides = [1, 1]} : vector<16x19xf32> to vector<16x1xf32>
    %14 = vector.extract_strided_slice %10 {offsets = [0, 18], sizes = [16, 1], strides = [1, 1]} : vector<16x19xf32> to vector<16x1xf32>
    %cst = arith.constant 0.000000e+00 : f32
    %15 = vector.broadcast %cst : f32 to vector<16x1xf32>
    %cst_7 = arith.constant 0.000000e+00 : f32
    %16 = vector.broadcast %cst_7 : f32 to vector<16x1xf32>
    %cst_8 = arith.constant 0.000000e+00 : f32
    %17 = vector.broadcast %cst_8 : f32 to vector<16x1xf32>
    %cst_9 = arith.constant 0.000000e+00 : f32
    %18 = vector.broadcast %cst_9 : f32 to vector<1x1xf32>
    %cst_10 = arith.constant 9.900000e-01 : f32
    %19 = vector.broadcast %cst_10 : f32 to vector<16x1xf32>
    %20 = arith.cmpf olt, %15, %19 : vector<16x1xf32>
    %cst_11 = arith.constant 3.000000e+00 : f32
    %21 = vector.broadcast %cst_11 : f32 to vector<16x1xf32>
    %22 = arith.cmpf olt, %17, %21 : vector<16x1xf32>
    %23 = arith.andi %20, %22 : vector<16x1xi1>
    %cst_12 = arith.constant 1.000000e+00 : f32
    %cst_13 = arith.constant 0.000000e+00 : f32
    %24 = vector.broadcast %cst_12 : f32 to vector<16x1xf32>
    %25 = vector.broadcast %cst_13 : f32 to vector<16x1xf32>
    %26 = arith.select %23, %24, %25 : vector<16x1xi1>, vector<16x1xf32>
    %cst_14 = arith.constant dense<0xFF800000> : vector<1xf32>
    %27 = vector.multi_reduction <maximumf>, %26, %cst_14 [0] : vector<16x1xf32> to vector<1xf32>
    %28 = vector.shape_cast %27 : vector<1xf32> to vector<1x1xf32>
    %cst_15 = arith.constant 5.000000e-01 : f32
    %29 = vector.broadcast %cst_15 : f32 to vector<1x1xf32>
    %30 = arith.cmpf ogt, %28, %29 : vector<1x1xf32>
    %31 = vector.extract_strided_slice %8 {offsets = [0, 0], sizes = [1, 32], strides = [1, 1]} : vector<3x32xf32> to vector<1x32xf32>
    %32 = vector.broadcast %31 : vector<1x32xf32> to vector<16x32xf32>
    %33 = arith.addf %0, %32 : vector<16x32xf32>
    %cst_16 = arith.constant dense<0.000000e+00> : vector<16xf32>
    %34 = vector.multi_reduction <add>, %33, %cst_16 [1] : vector<16x32xf32> to vector<16xf32>
    %35 = vector.shape_cast %34 : vector<16xf32> to vector<16x1xf32>
    %cst_17 = arith.constant 3.200000e+01 : f32
    %36 = vector.broadcast %cst_17 : f32 to vector<16x1xf32>
    %37 = arith.divf %35, %36 : vector<16x1xf32>
    %38 = vector.broadcast %37 : vector<16x1xf32> to vector<16x32xf32>
    %39 = arith.subf %33, %38 : vector<16x32xf32>
    %40 = arith.mulf %39, %39 : vector<16x32xf32>
    %cst_18 = arith.constant dense<0.000000e+00> : vector<16xf32>
    %41 = vector.multi_reduction <add>, %40, %cst_18 [1] : vector<16x32xf32> to vector<16xf32>
    %42 = vector.shape_cast %41 : vector<16xf32> to vector<16x1xf32>
    %cst_19 = arith.constant 3.200000e+01 : f32
    %43 = vector.broadcast %cst_19 : f32 to vector<16x1xf32>
    %44 = arith.divf %42, %43 : vector<16x1xf32>
    %45 = vector.broadcast %37 : vector<16x1xf32> to vector<16x32xf32>
    %46 = arith.subf %33, %45 : vector<16x32xf32>
    %cst_20 = arith.constant 9.99999974E-6 : f32
    %47 = vector.broadcast %cst_20 : f32 to vector<16x1xf32>
    %48 = arith.addf %44, %47 : vector<16x1xf32>
    %49 = math.rsqrt %48 : vector<16x1xf32>
    %50 = vector.broadcast %49 : vector<16x1xf32> to vector<16x32xf32>
    %51 = arith.mulf %46, %50 : vector<16x32xf32>
    %cst_21 = arith.constant dense<0.000000e+00> : vector<16x4xf32>
    %52 = tpu.matmul %51, %9, %cst_21 {dimension_numbers = #tpu.dot_dimension_numbers<[1], [0], [0], [1], [0, 0, 1, 1], [], []>} : vector<16x32xf32>, vector<32x4xf32>, vector<16x4xf32> -> vector<16x4xf32>
    %53 = vector.extract_strided_slice %52 {offsets = [0, 0], sizes = [16, 1], strides = [1, 1]} : vector<16x4xf32> to vector<16x1xf32>
    %54 = vector.extract_strided_slice %52 {offsets = [0, 1], sizes = [16, 1], strides = [1, 1]} : vector<16x4xf32> to vector<16x1xf32>
    %55 = vector.extract_strided_slice %52 {offsets = [0, 2], sizes = [16, 1], strides = [1, 1]} : vector<16x4xf32> to vector<16x1xf32>
    %56 = vector.extract_strided_slice %52 {offsets = [0, 3], sizes = [16, 1], strides = [1, 1]} : vector<16x4xf32> to vector<16x1xf32>
    %57 = vector.extract_strided_slice %53 {offsets = [15, 0], sizes = [1, 1], strides = [1, 1]} : vector<16x1xf32> to vector<1x1xf32>
    %58 = vector.extract_strided_slice %53 {offsets = [0, 0], sizes = [15, 1], strides = [1, 1]} : vector<16x1xf32> to vector<15x1xf32>
    %59 = tpu.concatenate %57, %58 in 0 : vector<1x1xf32>, vector<15x1xf32> -> vector<16x1xf32>
    %60 = arith.mulf %13, %59 : vector<16x1xf32>
    %61 = arith.addf %60, %54 : vector<16x1xf32>
    %62 = vector.extract_strided_slice %55 {offsets = [1, 0], sizes = [15, 1], strides = [1, 1]} : vector<16x1xf32> to vector<15x1xf32>
    %63 = vector.extract_strided_slice %55 {offsets = [0, 0], sizes = [1, 1], strides = [1, 1]} : vector<16x1xf32> to vector<1x1xf32>
    %64 = tpu.concatenate %62, %63 in 0 : vector<15x1xf32>, vector<1x1xf32> -> vector<16x1xf32>
    %65 = arith.mulf %14, %64 : vector<16x1xf32>
    %66 = arith.addf %61, %65 : vector<16x1xf32>
    %cst_22 = arith.constant dense<0.000000e+00> : vector<16x1xf32>
    %67 = tpu.matmul %11, %56, %cst_22 {dimension_numbers = #tpu.dot_dimension_numbers<[1], [0], [0], [1], [0, 0, 1, 1], [], []>} : vector<16x16xf32>, vector<16x1xf32>, vector<16x1xf32> -> vector<16x1xf32>
    %68 = arith.addf %66, %67 : vector<16x1xf32>
    %69 = arith.addf %68, %12 : vector<16x1xf32>
    %70 = arith.negf %69 : vector<16x1xf32>
    %71 = math.exp %70 : vector<16x1xf32>
    %cst_23 = arith.constant 1.000000e+00 : f32
    %72 = vector.broadcast %cst_23 : f32 to vector<16x1xf32>
    %73 = arith.addf %72, %71 : vector<16x1xf32>
    %74 = arith.divf %72, %73 : vector<16x1xf32>
    %cst_24 = arith.constant dense<0.000000e+00> : vector<16x32xf32>
    %75 = tpu.matmul %33, %2, %cst_24 {dimension_numbers = #tpu.dot_dimension_numbers<[1], [0], [0], [1], [0, 0, 1, 1], [], []>} : vector<16x32xf32>, vector<32x32xf32>, vector<16x32xf32> -> vector<16x32xf32>
    %76 = vector.broadcast %5 : vector<1x32xf32> to vector<16x32xf32>
    %77 = arith.addf %75, %76 : vector<16x32xf32>
    %78 = math.tanh %77 : vector<16x32xf32>
    %cst_25 = arith.constant dense<0.000000e+00> : vector<16x32xf32>
    %79 = tpu.matmul %78, %3, %cst_25 {dimension_numbers = #tpu.dot_dimension_numbers<[1], [0], [0], [1], [0, 0, 1, 1], [], []>} : vector<16x32xf32>, vector<32x32xf32>, vector<16x32xf32> -> vector<16x32xf32>
    %80 = arith.addf %33, %79 : vector<16x32xf32>
    %81 = vector.broadcast %6 : vector<1x32xf32> to vector<16x32xf32>
    %82 = arith.addf %80, %81 : vector<16x32xf32>
    %cst_26 = arith.constant 1.000000e+00 : f32
    %83 = vector.broadcast %cst_26 : f32 to vector<16x1xf32>
    %84 = arith.cmpf olt, %15, %83 : vector<16x1xf32>
    %cst_27 = arith.constant 1.000000e+00 : f32
    %cst_28 = arith.constant 0.000000e+00 : f32
    %85 = vector.broadcast %cst_27 : f32 to vector<16x1xf32>
    %86 = vector.broadcast %cst_28 : f32 to vector<16x1xf32>
    %87 = arith.select %84, %85, %86 : vector<16x1xi1>, vector<16x1xf32>
    %88 = arith.mulf %74, %87 : vector<16x1xf32>
    %89 = arith.addf %15, %88 : vector<16x1xf32>
    %cst_29 = arith.constant 9.900000e-01 : f32
    %90 = vector.broadcast %cst_29 : f32 to vector<16x1xf32>
    %91 = arith.cmpf ogt, %89, %90 : vector<16x1xf32>
    %cst_30 = arith.constant 0.000000e+00 : f32
    %92 = vector.broadcast %cst_30 : f32 to vector<16x1xf32>
    %93 = arith.select %91, %87, %92 : vector<16x1xi1>, vector<16x1xf32>
    %cst_31 = arith.constant 9.900000e-01 : f32
    %94 = vector.broadcast %cst_31 : f32 to vector<16x1xf32>
    %95 = arith.cmpf ole, %89, %94 : vector<16x1xf32>
    %cst_32 = arith.constant 0.000000e+00 : f32
    %96 = vector.broadcast %cst_32 : f32 to vector<16x1xf32>
    %97 = arith.select %95, %87, %96 : vector<16x1xi1>, vector<16x1xf32>
    %98 = arith.mulf %74, %97 : vector<16x1xf32>
    %99 = arith.addf %15, %98 : vector<16x1xf32>
    %cst_33 = arith.constant 1.000000e+00 : f32
    %100 = vector.broadcast %cst_33 : f32 to vector<16x1xf32>
    %101 = arith.subf %100, %99 : vector<16x1xf32>
    %102 = arith.mulf %93, %101 : vector<16x1xf32>
    %103 = arith.addf %16, %102 : vector<16x1xf32>
    %104 = arith.mulf %93, %103 : vector<16x1xf32>
    %105 = arith.addf %99, %104 : vector<16x1xf32>
    %106 = arith.addf %17, %97 : vector<16x1xf32>
    %107 = arith.addf %106, %93 : vector<16x1xf32>
    %108 = vector.shape_cast %30 : vector<1x1xi1> to vector<1x1xi1>
    %109 = vector.broadcast %108 : vector<1x1xi1> to vector<16x32xi1>
    %110 = arith.select %109, %82, %0 : vector<16x32xi1>, vector<16x32xf32>
    %111 = vector.shape_cast %30 : vector<1x1xi1> to vector<1x1xi1>
    %112 = vector.broadcast %111 : vector<1x1xi1> to vector<16x1xi1>
    %113 = arith.select %112, %105, %15 : vector<16x1xi1>, vector<16x1xf32>
    %114 = vector.shape_cast %30 : vector<1x1xi1> to vector<1x1xi1>
    %115 = vector.broadcast %114 : vector<1x1xi1> to vector<16x1xi1>
    %116 = arith.select %115, %103, %16 : vector<16x1xi1>, vector<16x1xf32>
    %117 = vector.shape_cast %30 : vector<1x1xi1> to vector<1x1xi1>
    %118 = vector.broadcast %117 : vector<1x1xi1> to vector<16x1xi1>
    %119 = arith.select %118, %107, %17 : vector<16x1xi1>, vector<16x1xf32>
    %120 = arith.addf %18, %28 : vector<1x1xf32>
    %c0_34 = arith.constant 0 : index
    %c0_35 = arith.constant 0 : index
    %c0_36 = arith.constant 0 : index
    %121 = vector.load %arg6[%c0_34, %c0_35, %c0_36] : memref<3x16x32xf32, #tpu.memory_space<vmem>>, vector<1x16x32xf32>
    %122 = vector.shape_cast %121 : vector<1x16x32xf32> to vector<16x32xf32>
    %123 = vector.shape_cast %82 : vector<16x32xf32> to vector<1x16x32xf32>
    tpu.vector_store %arg6[%c0_34, %c0_35, %c0_36], %123 {strides = array<i32>} : memref<3x16x32xf32, #tpu.memory_space<vmem>>, vector<1x16x32xf32>,
    %cst_37 = arith.constant 9.900000e-01 : f32
    %124 = vector.broadcast %cst_37 : f32 to vector<16x1xf32>
    %125 = arith.cmpf olt, %113, %124 : vector<16x1xf32>
    %cst_38 = arith.constant 3.000000e+00 : f32
    %126 = vector.broadcast %cst_38 : f32 to vector<16x1xf32>
    %127 = arith.cmpf olt, %119, %126 : vector<16x1xf32>
    %128 = arith.andi %125, %127 : vector<16x1xi1>
    %cst_39 = arith.constant 1.000000e+00 : f32
    %cst_40 = arith.constant 0.000000e+00 : f32
    %129 = vector.broadcast %cst_39 : f32 to vector<16x1xf32>
    %130 = vector.broadcast %cst_40 : f32 to vector<16x1xf32>
    %131 = arith.select %128, %129, %130 : vector<16x1xi1>, vector<16x1xf32>
    %cst_41 = arith.constant dense<0xFF800000> : vector<1xf32>
    %132 = vector.multi_reduction <maximumf>, %131, %cst_41 [0] : vector<16x1xf32> to vector<1xf32>
    %133 = vector.shape_cast %132 : vector<1xf32> to vector<1x1xf32>
    %cst_42 = arith.constant 5.000000e-01 : f32
    %134 = vector.broadcast %cst_42 : f32 to vector<1x1xf32>
    %135 = arith.cmpf ogt, %133, %134 : vector<1x1xf32>
    %136 = vector.extract_strided_slice %8 {offsets = [1, 0], sizes = [1, 32], strides = [1, 1]} : vector<3x32xf32> to vector<1x32xf32>
    %137 = vector.broadcast %136 : vector<1x32xf32> to vector<16x32xf32>
    %138 = arith.addf %110, %137 : vector<16x32xf32>
    %cst_43 = arith.constant dense<0.000000e+00> : vector<16xf32>
    %139 = vector.multi_reduction <add>, %138, %cst_43 [1] : vector<16x32xf32> to vector<16xf32>
    %140 = vector.shape_cast %139 : vector<16xf32> to vector<16x1xf32>
    %cst_44 = arith.constant 3.200000e+01 : f32
    %141 = vector.broadcast %cst_44 : f32 to vector<16x1xf32>
    %142 = arith.divf %140, %141 : vector<16x1xf32>
    %143 = vector.broadcast %142 : vector<16x1xf32> to vector<16x32xf32>
    %144 = arith.subf %138, %143 : vector<16x32xf32>
    %145 = arith.mulf %144, %144 : vector<16x32xf32>
    %cst_45 = arith.constant dense<0.000000e+00> : vector<16xf32>
    %146 = vector.multi_reduction <add>, %145, %cst_45 [1] : vector<16x32xf32> to vector<16xf32>
    %147 = vector.shape_cast %146 : vector<16xf32> to vector<16x1xf32>
    %cst_46 = arith.constant 3.200000e+01 : f32
    %148 = vector.broadcast %cst_46 : f32 to vector<16x1xf32>
    %149 = arith.divf %147, %148 : vector<16x1xf32>
    %150 = vector.broadcast %142 : vector<16x1xf32> to vector<16x32xf32>
    %151 = arith.subf %138, %150 : vector<16x32xf32>
    %cst_47 = arith.constant 9.99999974E-6 : f32
    %152 = vector.broadcast %cst_47 : f32 to vector<16x1xf32>
    %153 = arith.addf %149, %152 : vector<16x1xf32>
    %154 = math.rsqrt %153 : vector<16x1xf32>
    %155 = vector.broadcast %154 : vector<16x1xf32> to vector<16x32xf32>
    %156 = arith.mulf %151, %155 : vector<16x32xf32>
    %cst_48 = arith.constant dense<0.000000e+00> : vector<16x4xf32>
    %157 = tpu.matmul %156, %9, %cst_48 {dimension_numbers = #tpu.dot_dimension_numbers<[1], [0], [0], [1], [0, 0, 1, 1], [], []>} : vector<16x32xf32>, vector<32x4xf32>, vector<16x4xf32> -> vector<16x4xf32>
    %158 = vector.extract_strided_slice %157 {offsets = [0, 0], sizes = [16, 1], strides = [1, 1]} : vector<16x4xf32> to vector<16x1xf32>
    %159 = vector.extract_strided_slice %157 {offsets = [0, 1], sizes = [16, 1], strides = [1, 1]} : vector<16x4xf32> to vector<16x1xf32>
    %160 = vector.extract_strided_slice %157 {offsets = [0, 2], sizes = [16, 1], strides = [1, 1]} : vector<16x4xf32> to vector<16x1xf32>
    %161 = vector.extract_strided_slice %157 {offsets = [0, 3], sizes = [16, 1], strides = [1, 1]} : vector<16x4xf32> to vector<16x1xf32>
    %162 = vector.extract_strided_slice %158 {offsets = [15, 0], sizes = [1, 1], strides = [1, 1]} : vector<16x1xf32> to vector<1x1xf32>
    %163 = vector.extract_strided_slice %158 {offsets = [0, 0], sizes = [15, 1], strides = [1, 1]} : vector<16x1xf32> to vector<15x1xf32>
    %164 = tpu.concatenate %162, %163 in 0 : vector<1x1xf32>, vector<15x1xf32> -> vector<16x1xf32>
    %165 = arith.mulf %13, %164 : vector<16x1xf32>
    %166 = arith.addf %165, %159 : vector<16x1xf32>
    %167 = vector.extract_strided_slice %160 {offsets = [1, 0], sizes = [15, 1], strides = [1, 1]} : vector<16x1xf32> to vector<15x1xf32>
    %168 = vector.extract_strided_slice %160 {offsets = [0, 0], sizes = [1, 1], strides = [1, 1]} : vector<16x1xf32> to vector<1x1xf32>
    %169 = tpu.concatenate %167, %168 in 0 : vector<15x1xf32>, vector<1x1xf32> -> vector<16x1xf32>
    %170 = arith.mulf %14, %169 : vector<16x1xf32>
    %171 = arith.addf %166, %170 : vector<16x1xf32>
    %cst_49 = arith.constant dense<0.000000e+00> : vector<16x1xf32>
    %172 = tpu.matmul %11, %161, %cst_49 {dimension_numbers = #tpu.dot_dimension_numbers<[1], [0], [0], [1], [0, 0, 1, 1], [], []>} : vector<16x16xf32>, vector<16x1xf32>, vector<16x1xf32> -> vector<16x1xf32>
    %173 = arith.addf %171, %172 : vector<16x1xf32>
    %174 = arith.addf %173, %12 : vector<16x1xf32>
    %175 = arith.negf %174 : vector<16x1xf32>
    %176 = math.exp %175 : vector<16x1xf32>
    %cst_50 = arith.constant 1.000000e+00 : f32
    %177 = vector.broadcast %cst_50 : f32 to vector<16x1xf32>
    %178 = arith.addf %177, %176 : vector<16x1xf32>
    %179 = arith.divf %177, %178 : vector<16x1xf32>
    %cst_51 = arith.constant dense<0.000000e+00> : vector<16x32xf32>
    %180 = tpu.matmul %138, %2, %cst_51 {dimension_numbers = #tpu.dot_dimension_numbers<[1], [0], [0], [1], [0, 0, 1, 1], [], []>} : vector<16x32xf32>, vector<32x32xf32>, vector<16x32xf32> -> vector<16x32xf32>
    %181 = vector.broadcast %5 : vector<1x32xf32> to vector<16x32xf32>
    %182 = arith.addf %180, %181 : vector<16x32xf32>
    %183 = math.tanh %182 : vector<16x32xf32>
    %cst_52 = arith.constant dense<0.000000e+00> : vector<16x32xf32>
    %184 = tpu.matmul %183, %3, %cst_52 {dimension_numbers = #tpu.dot_dimension_numbers<[1], [0], [0], [1], [0, 0, 1, 1], [], []>} : vector<16x32xf32>, vector<32x32xf32>, vector<16x32xf32> -> vector<16x32xf32>
    %185 = arith.addf %138, %184 : vector<16x32xf32>
    %186 = vector.broadcast %6 : vector<1x32xf32> to vector<16x32xf32>
    %187 = arith.addf %185, %186 : vector<16x32xf32>
    %cst_53 = arith.constant 1.000000e+00 : f32
    %188 = vector.broadcast %cst_53 : f32 to vector<16x1xf32>
    %189 = arith.cmpf olt, %113, %188 : vector<16x1xf32>
    %cst_54 = arith.constant 1.000000e+00 : f32
    %cst_55 = arith.constant 0.000000e+00 : f32
    %190 = vector.broadcast %cst_54 : f32 to vector<16x1xf32>
    %191 = vector.broadcast %cst_55 : f32 to vector<16x1xf32>
    %192 = arith.select %189, %190, %191 : vector<16x1xi1>, vector<16x1xf32>
    %193 = arith.mulf %179, %192 : vector<16x1xf32>
    %194 = arith.addf %113, %193 : vector<16x1xf32>
    %cst_56 = arith.constant 9.900000e-01 : f32
    %195 = vector.broadcast %cst_56 : f32 to vector<16x1xf32>
    %196 = arith.cmpf ogt, %194, %195 : vector<16x1xf32>
    %cst_57 = arith.constant 0.000000e+00 : f32
    %197 = vector.broadcast %cst_57 : f32 to vector<16x1xf32>
    %198 = arith.select %196, %192, %197 : vector<16x1xi1>, vector<16x1xf32>
    %cst_58 = arith.constant 9.900000e-01 : f32
    %199 = vector.broadcast %cst_58 : f32 to vector<16x1xf32>
    %200 = arith.cmpf ole, %194, %199 : vector<16x1xf32>
    %cst_59 = arith.constant 0.000000e+00 : f32
    %201 = vector.broadcast %cst_59 : f32 to vector<16x1xf32>
    %202 = arith.select %200, %192, %201 : vector<16x1xi1>, vector<16x1xf32>
    %203 = arith.mulf %179, %202 : vector<16x1xf32>
    %204 = arith.addf %113, %203 : vector<16x1xf32>
    %cst_60 = arith.constant 1.000000e+00 : f32
    %205 = vector.broadcast %cst_60 : f32 to vector<16x1xf32>
    %206 = arith.subf %205, %204 : vector<16x1xf32>
    %207 = arith.mulf %198, %206 : vector<16x1xf32>
    %208 = arith.addf %116, %207 : vector<16x1xf32>
    %209 = arith.mulf %198, %208 : vector<16x1xf32>
    %210 = arith.addf %204, %209 : vector<16x1xf32>
    %211 = arith.addf %119, %202 : vector<16x1xf32>
    %212 = arith.addf %211, %198 : vector<16x1xf32>
    %213 = vector.shape_cast %135 : vector<1x1xi1> to vector<1x1xi1>
    %214 = vector.broadcast %213 : vector<1x1xi1> to vector<16x32xi1>
    %215 = arith.select %214, %187, %110 : vector<16x32xi1>, vector<16x32xf32>
    %216 = vector.shape_cast %135 : vector<1x1xi1> to vector<1x1xi1>
    %217 = vector.broadcast %216 : vector<1x1xi1> to vector<16x1xi1>
    %218 = arith.select %217, %210, %113 : vector<16x1xi1>, vector<16x1xf32>
    %219 = vector.shape_cast %135 : vector<1x1xi1> to vector<1x1xi1>
    %220 = vector.broadcast %219 : vector<1x1xi1> to vector<16x1xi1>
    %221 = arith.select %220, %208, %116 : vector<16x1xi1>, vector<16x1xf32>
    %222 = vector.shape_cast %135 : vector<1x1xi1> to vector<1x1xi1>
    %223 = vector.broadcast %222 : vector<1x1xi1> to vector<16x1xi1>
    %224 = arith.select %223, %212, %119 : vector<16x1xi1>, vector<16x1xf32>
    %225 = arith.addf %120, %133 : vector<1x1xf32>
    %c1 = arith.constant 1 : index
    %c0_61 = arith.constant 0 : index
    %c0_62 = arith.constant 0 : index
    %226 = vector.load %arg6[%c1, %c0_61, %c0_62] : memref<3x16x32xf32, #tpu.memory_space<vmem>>, vector<1x16x32xf32>
    %227 = vector.shape_cast %226 : vector<1x16x32xf32> to vector<16x32xf32>
    %228 = vector.shape_cast %187 : vector<16x32xf32> to vector<1x16x32xf32>
    tpu.vector_store %arg6[%c1, %c0_61, %c0_62], %228 {strides = array<i32>} : memref<3x16x32xf32, #tpu.memory_space<vmem>>, vector<1x16x32xf32>,
    %cst_63 = arith.constant 9.900000e-01 : f32
    %229 = vector.broadcast %cst_63 : f32 to vector<16x1xf32>
    %230 = arith.cmpf olt, %218, %229 : vector<16x1xf32>
    %cst_64 = arith.constant 3.000000e+00 : f32
    %231 = vector.broadcast %cst_64 : f32 to vector<16x1xf32>
    %232 = arith.cmpf olt, %224, %231 : vector<16x1xf32>
    %233 = arith.andi %230, %232 : vector<16x1xi1>
    %cst_65 = arith.constant 1.000000e+00 : f32
    %cst_66 = arith.constant 0.000000e+00 : f32
    %234 = vector.broadcast %cst_65 : f32 to vector<16x1xf32>
    %235 = vector.broadcast %cst_66 : f32 to vector<16x1xf32>
    %236 = arith.select %233, %234, %235 : vector<16x1xi1>, vector<16x1xf32>
    %cst_67 = arith.constant dense<0xFF800000> : vector<1xf32>
    %237 = vector.multi_reduction <maximumf>, %236, %cst_67 [0] : vector<16x1xf32> to vector<1xf32>
    %238 = vector.shape_cast %237 : vector<1xf32> to vector<1x1xf32>
    %cst_68 = arith.constant 5.000000e-01 : f32
    %239 = vector.broadcast %cst_68 : f32 to vector<1x1xf32>
    %240 = arith.cmpf ogt, %238, %239 : vector<1x1xf32>
    %241 = vector.extract_strided_slice %8 {offsets = [2, 0], sizes = [1, 32], strides = [1, 1]} : vector<3x32xf32> to vector<1x32xf32>
    %242 = vector.broadcast %241 : vector<1x32xf32> to vector<16x32xf32>
    %243 = arith.addf %215, %242 : vector<16x32xf32>
    %cst_69 = arith.constant dense<0.000000e+00> : vector<16xf32>
    %244 = vector.multi_reduction <add>, %243, %cst_69 [1] : vector<16x32xf32> to vector<16xf32>
    %245 = vector.shape_cast %244 : vector<16xf32> to vector<16x1xf32>
    %cst_70 = arith.constant 3.200000e+01 : f32
    %246 = vector.broadcast %cst_70 : f32 to vector<16x1xf32>
    %247 = arith.divf %245, %246 : vector<16x1xf32>
    %248 = vector.broadcast %247 : vector<16x1xf32> to vector<16x32xf32>
    %249 = arith.subf %243, %248 : vector<16x32xf32>
    %250 = arith.mulf %249, %249 : vector<16x32xf32>
    %cst_71 = arith.constant dense<0.000000e+00> : vector<16xf32>
    %251 = vector.multi_reduction <add>, %250, %cst_71 [1] : vector<16x32xf32> to vector<16xf32>
    %252 = vector.shape_cast %251 : vector<16xf32> to vector<16x1xf32>
    %cst_72 = arith.constant 3.200000e+01 : f32
    %253 = vector.broadcast %cst_72 : f32 to vector<16x1xf32>
    %254 = arith.divf %252, %253 : vector<16x1xf32>
    %255 = vector.broadcast %247 : vector<16x1xf32> to vector<16x32xf32>
    %256 = arith.subf %243, %255 : vector<16x32xf32>
    %cst_73 = arith.constant 9.99999974E-6 : f32
    %257 = vector.broadcast %cst_73 : f32 to vector<16x1xf32>
    %258 = arith.addf %254, %257 : vector<16x1xf32>
    %259 = math.rsqrt %258 : vector<16x1xf32>
    %260 = vector.broadcast %259 : vector<16x1xf32> to vector<16x32xf32>
    %261 = arith.mulf %256, %260 : vector<16x32xf32>
    %cst_74 = arith.constant dense<0.000000e+00> : vector<16x4xf32>
    %262 = tpu.matmul %261, %9, %cst_74 {dimension_numbers = #tpu.dot_dimension_numbers<[1], [0], [0], [1], [0, 0, 1, 1], [], []>} : vector<16x32xf32>, vector<32x4xf32>, vector<16x4xf32> -> vector<16x4xf32>
    %263 = vector.extract_strided_slice %262 {offsets = [0, 0], sizes = [16, 1], strides = [1, 1]} : vector<16x4xf32> to vector<16x1xf32>
    %264 = vector.extract_strided_slice %262 {offsets = [0, 1], sizes = [16, 1], strides = [1, 1]} : vector<16x4xf32> to vector<16x1xf32>
    %265 = vector.extract_strided_slice %262 {offsets = [0, 2], sizes = [16, 1], strides = [1, 1]} : vector<16x4xf32> to vector<16x1xf32>
    %266 = vector.extract_strided_slice %262 {offsets = [0, 3], sizes = [16, 1], strides = [1, 1]} : vector<16x4xf32> to vector<16x1xf32>
    %267 = vector.extract_strided_slice %263 {offsets = [15, 0], sizes = [1, 1], strides = [1, 1]} : vector<16x1xf32> to vector<1x1xf32>
    %268 = vector.extract_strided_slice %263 {offsets = [0, 0], sizes = [15, 1], strides = [1, 1]} : vector<16x1xf32> to vector<15x1xf32>
    %269 = tpu.concatenate %267, %268 in 0 : vector<1x1xf32>, vector<15x1xf32> -> vector<16x1xf32>
    %270 = arith.mulf %13, %269 : vector<16x1xf32>
    %271 = arith.addf %270, %264 : vector<16x1xf32>
    %272 = vector.extract_strided_slice %265 {offsets = [1, 0], sizes = [15, 1], strides = [1, 1]} : vector<16x1xf32> to vector<15x1xf32>
    %273 = vector.extract_strided_slice %265 {offsets = [0, 0], sizes = [1, 1], strides = [1, 1]} : vector<16x1xf32> to vector<1x1xf32>
    %274 = tpu.concatenate %272, %273 in 0 : vector<15x1xf32>, vector<1x1xf32> -> vector<16x1xf32>
    %275 = arith.mulf %14, %274 : vector<16x1xf32>
    %276 = arith.addf %271, %275 : vector<16x1xf32>
    %cst_75 = arith.constant dense<0.000000e+00> : vector<16x1xf32>
    %277 = tpu.matmul %11, %266, %cst_75 {dimension_numbers = #tpu.dot_dimension_numbers<[1], [0], [0], [1], [0, 0, 1, 1], [], []>} : vector<16x16xf32>, vector<16x1xf32>, vector<16x1xf32> -> vector<16x1xf32>
    %278 = arith.addf %276, %277 : vector<16x1xf32>
    %279 = arith.addf %278, %12 : vector<16x1xf32>
    %280 = arith.negf %279 : vector<16x1xf32>
    %281 = math.exp %280 : vector<16x1xf32>
    %cst_76 = arith.constant 1.000000e+00 : f32
    %282 = vector.broadcast %cst_76 : f32 to vector<16x1xf32>
    %283 = arith.addf %282, %281 : vector<16x1xf32>
    %284 = arith.divf %282, %283 : vector<16x1xf32>
    %cst_77 = arith.constant dense<0.000000e+00> : vector<16x32xf32>
    %285 = tpu.matmul %243, %2, %cst_77 {dimension_numbers = #tpu.dot_dimension_numbers<[1], [0], [0], [1], [0, 0, 1, 1], [], []>} : vector<16x32xf32>, vector<32x32xf32>, vector<16x32xf32> -> vector<16x32xf32>
    %286 = vector.broadcast %5 : vector<1x32xf32> to vector<16x32xf32>
    %287 = arith.addf %285, %286 : vector<16x32xf32>
    %288 = math.tanh %287 : vector<16x32xf32>
    %cst_78 = arith.constant dense<0.000000e+00> : vector<16x32xf32>
    %289 = tpu.matmul %288, %3, %cst_78 {dimension_numbers = #tpu.dot_dimension_numbers<[1], [0], [0], [1], [0, 0, 1, 1], [], []>} : vector<16x32xf32>, vector<32x32xf32>, vector<16x32xf32> -> vector<16x32xf32>
    %290 = arith.addf %243, %289 : vector<16x32xf32>
    %291 = vector.broadcast %6 : vector<1x32xf32> to vector<16x32xf32>
    %292 = arith.addf %290, %291 : vector<16x32xf32>
    %cst_79 = arith.constant 1.000000e+00 : f32
    %293 = vector.broadcast %cst_79 : f32 to vector<16x1xf32>
    %294 = arith.cmpf olt, %218, %293 : vector<16x1xf32>
    %cst_80 = arith.constant 1.000000e+00 : f32
    %cst_81 = arith.constant 0.000000e+00 : f32
    %295 = vector.broadcast %cst_80 : f32 to vector<16x1xf32>
    %296 = vector.broadcast %cst_81 : f32 to vector<16x1xf32>
    %297 = arith.select %294, %295, %296 : vector<16x1xi1>, vector<16x1xf32>
    %298 = arith.mulf %284, %297 : vector<16x1xf32>
    %299 = arith.addf %218, %298 : vector<16x1xf32>
    %cst_82 = arith.constant 9.900000e-01 : f32
    %300 = vector.broadcast %cst_82 : f32 to vector<16x1xf32>
    %301 = arith.cmpf ogt, %299, %300 : vector<16x1xf32>
    %cst_83 = arith.constant 0.000000e+00 : f32
    %302 = vector.broadcast %cst_83 : f32 to vector<16x1xf32>
    %303 = arith.select %301, %297, %302 : vector<16x1xi1>, vector<16x1xf32>
    %cst_84 = arith.constant 9.900000e-01 : f32
    %304 = vector.broadcast %cst_84 : f32 to vector<16x1xf32>
    %305 = arith.cmpf ole, %299, %304 : vector<16x1xf32>
    %cst_85 = arith.constant 0.000000e+00 : f32
    %306 = vector.broadcast %cst_85 : f32 to vector<16x1xf32>
    %307 = arith.select %305, %297, %306 : vector<16x1xi1>, vector<16x1xf32>
    %308 = arith.mulf %284, %307 : vector<16x1xf32>
    %309 = arith.addf %218, %308 : vector<16x1xf32>
    %cst_86 = arith.constant 1.000000e+00 : f32
    %310 = vector.broadcast %cst_86 : f32 to vector<16x1xf32>
    %311 = arith.subf %310, %309 : vector<16x1xf32>
    %312 = arith.mulf %303, %311 : vector<16x1xf32>
    %313 = arith.addf %221, %312 : vector<16x1xf32>
    %314 = arith.addf %224, %307 : vector<16x1xf32>
    %315 = arith.addf %314, %303 : vector<16x1xf32>
    %316 = vector.shape_cast %240 : vector<1x1xi1> to vector<1x1xi1>
    %317 = vector.broadcast %316 : vector<1x1xi1> to vector<16x32xi1>
    %318 = arith.select %317, %292, %215 : vector<16x32xi1>, vector<16x32xf32>
    %319 = vector.shape_cast %240 : vector<1x1xi1> to vector<1x1xi1>
    %320 = vector.broadcast %319 : vector<1x1xi1> to vector<16x1xi1>
    %321 = arith.select %320, %313, %221 : vector<16x1xi1>, vector<16x1xf32>
    %322 = vector.shape_cast %240 : vector<1x1xi1> to vector<1x1xi1>
    %323 = vector.broadcast %322 : vector<1x1xi1> to vector<16x1xi1>
    %324 = arith.select %323, %315, %224 : vector<16x1xi1>, vector<16x1xf32>
    %325 = arith.addf %225, %238 : vector<1x1xf32>
    %c2 = arith.constant 2 : index
    %c0_87 = arith.constant 0 : index
    %c0_88 = arith.constant 0 : index
    %326 = vector.load %arg6[%c2, %c0_87, %c0_88] : memref<3x16x32xf32, #tpu.memory_space<vmem>>, vector<1x16x32xf32>
    %327 = vector.shape_cast %326 : vector<1x16x32xf32> to vector<16x32xf32>
    %328 = vector.shape_cast %292 : vector<16x32xf32> to vector<1x16x32xf32>
    tpu.vector_store %arg6[%c2, %c0_87, %c0_88], %328 {strides = array<i32>} : memref<3x16x32xf32, #tpu.memory_space<vmem>>, vector<1x16x32xf32>,
    %cst_89 = arith.constant dense<0.000000e+00> : vector<16x32xf32>
    %329 = tpu.matmul %318, %4, %cst_89 {dimension_numbers = #tpu.dot_dimension_numbers<[1], [0], [0], [1], [0, 0, 1, 1], [], []>} : vector<16x32xf32>, vector<32x32xf32>, vector<16x32xf32> -> vector<16x32xf32>
    %330 = vector.broadcast %7 : vector<1x32xf32> to vector<16x32xf32>
    %331 = arith.addf %329, %330 : vector<16x32xf32>
    %cst_90 = arith.constant -1.000000e+30 : f32
    %332 = vector.broadcast %cst_90 : f32 to vector<16x1xf32>
    %cst_91 = arith.constant 0.000000e+00 : f32
    %333 = vector.broadcast %cst_91 : f32 to vector<16x1xf32>
    %cst_92 = arith.constant 0.000000e+00 : f32
    %334 = vector.broadcast %cst_92 : f32 to vector<16x32xf32>
    %c0_93 = arith.constant 0 : index
    %c0_94 = arith.constant 0 : index
    %c0_95 = arith.constant 0 : index
    %335 = vector.load %arg6[%c0_93, %c0_94, %c0_95] : memref<3x16x32xf32, #tpu.memory_space<vmem>>, vector<1x16x32xf32>
    %336 = vector.shape_cast %335 : vector<1x16x32xf32> to vector<16x32xf32>
    %337 = arith.mulf %331, %336 : vector<16x32xf32>
    %cst_96 = arith.constant dense<0.000000e+00> : vector<16xf32>
    %338 = vector.multi_reduction <add>, %337, %cst_96 [1] : vector<16x32xf32> to vector<16xf32>
    %339 = vector.shape_cast %338 : vector<16xf32> to vector<16x1xf32>
    %cst_97 = arith.constant -1.000000e+30 : f32
    %340 = vector.shape_cast %30 : vector<1x1xi1> to vector<1x1xi1>
    %341 = vector.broadcast %340 : vector<1x1xi1> to vector<16x1xi1>
    %342 = vector.broadcast %cst_97 : f32 to vector<16x1xf32>
    %343 = arith.select %341, %339, %342 : vector<16x1xi1>, vector<16x1xf32>
    %344 = arith.maximumf %332, %343 : vector<16x1xf32>
    %345 = arith.subf %332, %344 : vector<16x1xf32>
    %346 = math.exp %345 : vector<16x1xf32>
    %347 = arith.subf %343, %344 : vector<16x1xf32>
    %348 = math.exp %347 : vector<16x1xf32>
    %cst_98 = arith.constant 0.000000e+00 : f32
    %349 = vector.shape_cast %30 : vector<1x1xi1> to vector<1x1xi1>
    %350 = vector.broadcast %349 : vector<1x1xi1> to vector<16x1xi1>
    %351 = vector.broadcast %cst_98 : f32 to vector<16x1xf32>
    %352 = arith.select %350, %348, %351 : vector<16x1xi1>, vector<16x1xf32>
    %353 = arith.mulf %346, %333 : vector<16x1xf32>
    %354 = arith.addf %353, %352 : vector<16x1xf32>
    %355 = vector.broadcast %346 : vector<16x1xf32> to vector<16x32xf32>
    %356 = arith.mulf %355, %334 : vector<16x32xf32>
    %357 = vector.broadcast %352 : vector<16x1xf32> to vector<16x32xf32>
    %358 = arith.mulf %357, %336 : vector<16x32xf32>
    %359 = arith.addf %356, %358 : vector<16x32xf32>
    %c1_99 = arith.constant 1 : index
    %c0_100 = arith.constant 0 : index
    %c0_101 = arith.constant 0 : index
    %360 = vector.load %arg6[%c1_99, %c0_100, %c0_101] : memref<3x16x32xf32, #tpu.memory_space<vmem>>, vector<1x16x32xf32>
    %361 = vector.shape_cast %360 : vector<1x16x32xf32> to vector<16x32xf32>
    %362 = arith.mulf %331, %361 : vector<16x32xf32>
    %cst_102 = arith.constant dense<0.000000e+00> : vector<16xf32>
    %363 = vector.multi_reduction <add>, %362, %cst_102 [1] : vector<16x32xf32> to vector<16xf32>
    %364 = vector.shape_cast %363 : vector<16xf32> to vector<16x1xf32>
    %cst_103 = arith.constant -1.000000e+30 : f32
    %365 = vector.shape_cast %135 : vector<1x1xi1> to vector<1x1xi1>
    %366 = vector.broadcast %365 : vector<1x1xi1> to vector<16x1xi1>
    %367 = vector.broadcast %cst_103 : f32 to vector<16x1xf32>
    %368 = arith.select %366, %364, %367 : vector<16x1xi1>, vector<16x1xf32>
    %369 = arith.maximumf %344, %368 : vector<16x1xf32>
    %370 = arith.subf %344, %369 : vector<16x1xf32>
    %371 = math.exp %370 : vector<16x1xf32>
    %372 = arith.subf %368, %369 : vector<16x1xf32>
    %373 = math.exp %372 : vector<16x1xf32>
    %cst_104 = arith.constant 0.000000e+00 : f32
    %374 = vector.shape_cast %135 : vector<1x1xi1> to vector<1x1xi1>
    %375 = vector.broadcast %374 : vector<1x1xi1> to vector<16x1xi1>
    %376 = vector.broadcast %cst_104 : f32 to vector<16x1xf32>
    %377 = arith.select %375, %373, %376 : vector<16x1xi1>, vector<16x1xf32>
    %378 = arith.mulf %371, %354 : vector<16x1xf32>
    %379 = arith.addf %378, %377 : vector<16x1xf32>
    %380 = vector.broadcast %371 : vector<16x1xf32> to vector<16x32xf32>
    %381 = arith.mulf %380, %359 : vector<16x32xf32>
    %382 = vector.broadcast %377 : vector<16x1xf32> to vector<16x32xf32>
    %383 = arith.mulf %382, %361 : vector<16x32xf32>
    %384 = arith.addf %381, %383 : vector<16x32xf32>
    %c2_105 = arith.constant 2 : index
    %c0_106 = arith.constant 0 : index
    %c0_107 = arith.constant 0 : index
    %385 = vector.load %arg6[%c2_105, %c0_106, %c0_107] : memref<3x16x32xf32, #tpu.memory_space<vmem>>, vector<1x16x32xf32>
    %386 = vector.shape_cast %385 : vector<1x16x32xf32> to vector<16x32xf32>
    %387 = arith.mulf %331, %386 : vector<16x32xf32>
    %cst_108 = arith.constant dense<0.000000e+00> : vector<16xf32>
    %388 = vector.multi_reduction <add>, %387, %cst_108 [1] : vector<16x32xf32> to vector<16xf32>
    %389 = vector.shape_cast %388 : vector<16xf32> to vector<16x1xf32>
    %cst_109 = arith.constant -1.000000e+30 : f32
    %390 = vector.shape_cast %240 : vector<1x1xi1> to vector<1x1xi1>
    %391 = vector.broadcast %390 : vector<1x1xi1> to vector<16x1xi1>
    %392 = vector.broadcast %cst_109 : f32 to vector<16x1xf32>
    %393 = arith.select %391, %389, %392 : vector<16x1xi1>, vector<16x1xf32>
    %394 = arith.maximumf %369, %393 : vector<16x1xf32>
    %395 = arith.subf %369, %394 : vector<16x1xf32>
    %396 = math.exp %395 : vector<16x1xf32>
    %397 = arith.subf %393, %394 : vector<16x1xf32>
    %398 = math.exp %397 : vector<16x1xf32>
    %cst_110 = arith.constant 0.000000e+00 : f32
    %399 = vector.shape_cast %240 : vector<1x1xi1> to vector<1x1xi1>
    %400 = vector.broadcast %399 : vector<1x1xi1> to vector<16x1xi1>
    %401 = vector.broadcast %cst_110 : f32 to vector<16x1xf32>
    %402 = arith.select %400, %398, %401 : vector<16x1xi1>, vector<16x1xf32>
    %403 = arith.mulf %396, %379 : vector<16x1xf32>
    %404 = arith.addf %403, %402 : vector<16x1xf32>
    %405 = vector.broadcast %396 : vector<16x1xf32> to vector<16x32xf32>
    %406 = arith.mulf %405, %384 : vector<16x32xf32>
    %407 = vector.broadcast %402 : vector<16x1xf32> to vector<16x32xf32>
    %408 = arith.mulf %407, %386 : vector<16x32xf32>
    %409 = arith.addf %406, %408 : vector<16x32xf32>
    %410 = tpu.reciprocal %404 {approx = true} : vector<16x1xf32> -> vector<16x1xf32>
    %411 = vector.broadcast %410 : vector<16x1xf32> to vector<16x32xf32>
    %412 = arith.mulf %409, %411 : vector<16x32xf32>
    %413 = vector.extract_strided_slice %412 {offsets = [0, 0], sizes = [1, 32], strides = [1, 1]} : vector<16x32xf32> to vector<1x32xf32>
    %414 = vector.extract_strided_slice %412 {offsets = [1, 0], sizes = [1, 32], strides = [1, 1]} : vector<16x32xf32> to vector<1x32xf32>
    %415 = vector.extract_strided_slice %412 {offsets = [2, 0], sizes = [1, 32], strides = [1, 1]} : vector<16x32xf32> to vector<1x32xf32>
    %416 = vector.extract_strided_slice %412 {offsets = [3, 0], sizes = [1, 32], strides = [1, 1]} : vector<16x32xf32> to vector<1x32xf32>
    %417 = tpu.concatenate %413, %414, %415, %416 in 1 : vector<1x32xf32>, vector<1x32xf32>, vector<1x32xf32>, vector<1x32xf32> -> vector<1x128xf32>
    %418 = vector.extract_strided_slice %412 {offsets = [4, 0], sizes = [1, 32], strides = [1, 1]} : vector<16x32xf32> to vector<1x32xf32>
    %419 = vector.extract_strided_slice %412 {offsets = [5, 0], sizes = [1, 32], strides = [1, 1]} : vector<16x32xf32> to vector<1x32xf32>
    %420 = vector.extract_strided_slice %412 {offsets = [6, 0], sizes = [1, 32], strides = [1, 1]} : vector<16x32xf32> to vector<1x32xf32>
    %421 = vector.extract_strided_slice %412 {offsets = [7, 0], sizes = [1, 32], strides = [1, 1]} : vector<16x32xf32> to vector<1x32xf32>
    %422 = tpu.concatenate %418, %419, %420, %421 in 1 : vector<1x32xf32>, vector<1x32xf32>, vector<1x32xf32>, vector<1x32xf32> -> vector<1x128xf32>
    %423 = vector.extract_strided_slice %412 {offsets = [8, 0], sizes = [1, 32], strides = [1, 1]} : vector<16x32xf32> to vector<1x32xf32>
    %424 = vector.extract_strided_slice %412 {offsets = [9, 0], sizes = [1, 32], strides = [1, 1]} : vector<16x32xf32> to vector<1x32xf32>
    %425 = vector.extract_strided_slice %412 {offsets = [10, 0], sizes = [1, 32], strides = [1, 1]} : vector<16x32xf32> to vector<1x32xf32>
    %426 = vector.extract_strided_slice %412 {offsets = [11, 0], sizes = [1, 32], strides = [1, 1]} : vector<16x32xf32> to vector<1x32xf32>
    %427 = tpu.concatenate %423, %424, %425, %426 in 1 : vector<1x32xf32>, vector<1x32xf32>, vector<1x32xf32>, vector<1x32xf32> -> vector<1x128xf32>
    %428 = vector.extract_strided_slice %412 {offsets = [12, 0], sizes = [1, 32], strides = [1, 1]} : vector<16x32xf32> to vector<1x32xf32>
    %429 = vector.extract_strided_slice %412 {offsets = [13, 0], sizes = [1, 32], strides = [1, 1]} : vector<16x32xf32> to vector<1x32xf32>
    %430 = vector.extract_strided_slice %412 {offsets = [14, 0], sizes = [1, 32], strides = [1, 1]} : vector<16x32xf32> to vector<1x32xf32>
    %431 = vector.extract_strided_slice %412 {offsets = [15, 0], sizes = [1, 32], strides = [1, 1]} : vector<16x32xf32> to vector<1x32xf32>
    %432 = tpu.concatenate %428, %429, %430, %431 in 1 : vector<1x32xf32>, vector<1x32xf32>, vector<1x32xf32>, vector<1x32xf32> -> vector<1x128xf32>
    %433 = tpu.concatenate %417, %422, %427, %432 in 0 : vector<1x128xf32>, vector<1x128xf32>, vector<1x128xf32>, vector<1x128xf32> -> vector<4x128xf32>
    %c0_111 = arith.constant 0 : index
    %c0_112 = arith.constant 0 : index
    %434 = vector.load %arg4[%c0_111, %c0_112] : memref<4x128xf32, #tpu.memory_space<vmem>>, vector<4x128xf32>
    tpu.vector_store %arg4[%c0_111, %c0_112], %433 {strides = array<i32>} : memref<4x128xf32, #tpu.memory_space<vmem>>, vector<4x128xf32>,
    %435 = arith.addf %321, %324 : vector<16x1xf32>
    %cst_113 = arith.constant dense<0.000000e+00> : vector<1xf32>
    %436 = vector.multi_reduction <add>, %435, %cst_113 [0] : vector<16x1xf32> to vector<1xf32>
    %437 = vector.shape_cast %436 : vector<1xf32> to vector<1x1xf32>
    %cst_114 = arith.constant 1.000000e-03 : f32
    %438 = vector.broadcast %cst_114 : f32 to vector<1x1xf32>
    %439 = arith.mulf %438, %437 : vector<1x1xf32>
    %cst_115 = arith.constant 4.000000e+00 : f32
    %440 = vector.broadcast %cst_115 : f32 to vector<1x1xf32>
    %441 = arith.divf %439, %440 : vector<1x1xf32>
    %cst_116 = arith.constant dense<0.000000e+00> : vector<1xf32>
    %442 = vector.multi_reduction <add>, %321, %cst_116 [0] : vector<16x1xf32> to vector<1xf32>
    %443 = vector.shape_cast %442 : vector<1xf32> to vector<1x1xf32>
    %cst_117 = arith.constant 1.600000e+01 : f32
    %444 = vector.broadcast %cst_117 : f32 to vector<1x1xf32>
    %445 = arith.divf %443, %444 : vector<1x1xf32>
    %446 = arith.addf %325, %445 : vector<1x1xf32>
    %cst_118 = arith.constant -1.000000e-03 : f32
    %447 = vector.broadcast %cst_118 : f32 to vector<1x1xf32>
    %448 = arith.mulf %447, %446 : vector<1x1xf32>
    %449 = tpu.iota {dimensions = array<i32: 1>} : vector<1x128xi32>
    %c0_i32 = arith.constant 0 : i32
    %450 = vector.broadcast %c0_i32 : i32 to vector<1x128xi32>
    %451 = arith.cmpi eq, %449, %450 : vector<1x128xi32>
    %c1_i32 = arith.constant 1 : i32
    %452 = vector.broadcast %c1_i32 : i32 to vector<1x128xi32>
    %453 = arith.cmpi eq, %449, %452 : vector<1x128xi32>
    %cst_119 = arith.constant 0.000000e+00 : f32
    %454 = vector.shape_cast %448 : vector<1x1xf32> to vector<1x1xf32>
    %455 = vector.broadcast %454 : vector<1x1xf32> to vector<1x128xf32>
    %456 = vector.broadcast %cst_119 : f32 to vector<1x128xf32>
    %457 = arith.select %453, %455, %456 : vector<1x128xi1>, vector<1x128xf32>
    %458 = vector.shape_cast %441 : vector<1x1xf32> to vector<1x1xf32>
    %459 = vector.broadcast %458 : vector<1x1xf32> to vector<1x128xf32>
    %460 = arith.select %451, %459, %457 : vector<1x128xi1>, vector<1x128xf32>
    %c0_120 = arith.constant 0 : index
    %c0_121 = arith.constant 0 : index
    %461 = vector.load %arg5[%c0_120, %c0_121] : memref<1x128xf32, #tpu.memory_space<vmem>>, vector<1x128xf32>
    tpu.vector_store %arg5[%c0_120, %c0_121], %460 {strides = array<i32>} : memref<1x128xf32, #tpu.memory_space<vmem>>, vector<1x128xf32>,
    return
  }
}

</mosaic_0001>

<bundles_post_ra>
// kernel: act_block_forward.1
= control target key start
LH: loop header
LB: loop body
LE: loop exit
PB: predicated region body
PF: predicated region fallthrough
CT: control target
= control target key end

     0   :  { %v45_v0 = vlaneseq  ;;  %vm51_vm0 = vcmask 261120   ;;  %vm218_vm1 = vcmask 130048   ;;  %s2236_s7 = smov 125   ;;  %vm164_vm2 = vcmask 1040384   ;;  %s2237_s25 = smov 17   ;;  %s2901_s1 = inlined_call_operand.vmem [shape: f32[102,32], index: 1, kind: input, shape index: {}]   ;;  %s2902_s0 = inlined_call_operand.vmem [shape: f32[16,32], index: 0, kind: input, shape index: {}]   ;;  %s2903_s2 = inlined_call_operand.vmem [shape: f32[32,4], index: 2, kind: input, shape index: {}]   ;;  %s2904_s3 = inlined_call_operand.vmem [shape: f32[16,19], index: 3, kind: input, shape index: {}]   ;;  %s2905_s4 = inlined_call_operand.vmem [shape: f32[4,128], index: 4, kind: output, shape index: {0}]   ;;  %s2906_s5 = inlined_call_operand.vmem [shape: f32[1,128], index: 5, kind: output, shape index: {1}]  }
   0x1   :  { %v2283_v2 = vld [vmem:[%s2901_s1 + $0x60] sm:$0x3f]  ;;  %v20_v5 = vld [vmem:[%s2902_s0 + $0x8] sm:$0xff]  ;;  %v2308_v21 = vld [vmem:[%s2903_s2 + $0x18] sm:$0xff]  ;;  %vm186_vm3 = vcmask 1046528   ;;  %s2238_s26 = smov 16  }
   0x2   :  { %v2278_v1 = vshrl.u32 %v45_v0, 7  ;;  %v19_v4 = vld [vmem:[%s2902_s0] sm:$0xff]  ;;  %v2313_v22 = vld [vmem:[%s2903_s2 + $0x10] sm:$0xff]  ;;  %2013 = vmatprep.subr.mxu0 %v2308_v21  ;;  %v2320_v23 = vld [vmem:[%s2903_s2 + $0x8] sm:$0xff]  ;;  %s2239_s27 = smov 127   ;;  %s2240_s28 = smov 1  }
   0x3   :  { %2014 = vmatpush3.msra.mxu0 %v2308_v21  ;;  %v2329_v24 = vld [vmem:[%s2903_s2] sm:$0xff]  ;;  %v2353_v40 = vld [vmem:[%s2904_s3 + $0x8] sm:$0xff]  ;;  %v2358_v41 = vld [vmem:[%s2901_s1 + $0x18] sm:$0xff]  ;;  %vm559_vm13 = vcmask 146568   ;;  %s2245_s16 = smov 32   ;;  %s2246_s17 = smov 96  }
   0x4   :  { %v47_v3 = vsub.s32 3, %v2278_v1  ;;  %2015 = vmatprep.subr.mxu0 %v2313_v22  ;;  %v2338_v35 = vld [vmem:[%s2904_s3] sm:$0xff]  ;;  %v2363_v42 = vld [vmem:[%s2901_s1 + $0x10] sm:$0xff]  ;;  %v2372_v43 = vld [vmem:[%s2901_s1 + $0x8] sm:$0xff]  ;;  %v332_v50 = vsub.s32 0, %v2278_v1  ;;  %v502_v59 = vsub.s32 1, %v2278_v1 }
   0x5   :  { %2016 = vmatpush3.msra.mxu0 %v2313_v22  ;;  %2028 = vmatprep.mubr.msk.f32.mxu1 %vm218_vm1, %v2338_v35  ;;  %v2381_v44 = vld [vmem:[%s2901_s1] sm:$0xff]  ;;  %v2400_v45 = vld [vmem:[%s2901_s1 + $0x38] sm:$0xff]  ;;  %v2405_v46 = vld [vmem:[%s2901_s1 + $0x30] sm:$0xff]  ;;  %v572_v60 = vsub.s32 4, %v2278_v1 }
   0x6   :  { %v48_v6 = vrot.slane %v2283_v2, %v47_v3  ;;  %2017 = vmatprep.subr.mxu0 %v2320_v23  ;;  %v2413_v47 = vld [vmem:[%s2901_s1 + $0x28] sm:$0xff]  ;;  %v2420_v48 = vld [vmem:[%s2901_s1 + $0x20] sm:$0xff]  ;;  %v2432_v52 = vrot.slane %v2283_v2, %v332_v50  ;;  %v2443_v61 = vrot.slane %v2283_v2, %v502_v59 }
   0x7   :  { %2018 = vmatpush3.msra.mxu0 %v2320_v23  ;;  %v573_v3 = vrot.slane %v2283_v2, %v572_v60 }
   0x8   :  { %v2293_v7 = vadd.f32 %v48_v6, %v19_v4  ;;  %v2295_v8 = vadd.f32 %v48_v6, %v20_v5  ;;  %2019 = vmatprep.subr.mxu0 %v2329_v24 }
   0x9   :  { %2020 = vmatpush3.msra.mxu0 %v2329_v24 }
   0xa   :  { %v52_v9 = vsel %vm51_vm0, %v2293_v7, 0.0  ;;  %v55_v10 = vsel %vm51_vm0, %v2295_v8, 0.0  ;;  %2042 = vmatprep.subr.mxu0 %v2400_v45 }
   0xb   :  { %53 = vadd.xlane.f32.xlu0 %v52_v9 }
   0xf   :  { %56 = vadd.xlane.f32.xlu0 %v55_v10 }
  0x94   :  { %v54_v11 = vpop.xlane.xlu0 %53 }
  0x95   :  { %v59_v12 = vmul.f32 0.03125, %v54_v11 }
  0x97   :  { %v61_v13 = vsub.f32 %v2293_v7, %v59_v12 }
  0x98   :  { %v57_v14 = vpop.xlane.xlu0 %56 }
  0x99   :  { %v60_v15 = vmul.f32 0.03125, %v57_v14  ;;  %v63_v16 = vmul.f32 %v61_v13, %v61_v13 }
  0x9b   :  { %v62_v17 = vsub.f32 %v2295_v8, %v60_v15  ;;  %v65_v18 = vsel %vm51_vm0, %v63_v16, 0.0 }
  0x9c   :  { %66 = vadd.xlane.f32.xlu1 %v65_v18 }
  0x9d   :  { %v64_v19 = vmul.f32 %v62_v17, %v62_v17 }
  0x9f   :  { %v68_v20 = vsel %vm51_vm0, %v64_v19, 0.0 }
  0xa0   :  { %69 = vadd.xlane.f32.xlu1 %v68_v20 }
 0x125   :  { %v67_v25 = vpop.xlane.xlu1 %66 }
 0x126   :  { %v71_v26 = vmul.f32 0.03125, %v67_v25 }
 0x128   :  { %v73_v27 = vadd.f32 1e-05, %v71_v26 }
 0x129   :  { %v70_v28 = vpop.xlane.xlu1 %69 }
 0x12a   :  { %2157 = vrsqrt.f32 %v73_v27  ;;  %v72_v29 = vmul.f32 0.03125, %v70_v28 }
 0x12c   :  { %v74_v30 = vadd.f32 1e-05, %v72_v29 }
 0x12e   :  { %2159 = vrsqrt.f32 %v74_v30 }
 0x137   :  { %v2158_v31 = vpop.eup %2157 }
 0x138   :  { %v77_v32 = vmul.f32 %v2158_v31, %v61_v13 }
 0x13a   :  { %2021 = vmatprep.mubr.msk.f32.mxu0 %vm51_vm0, %v77_v32 }
 0x13b   :  { %v2160_v33 = vpop.eup %2159 }
 0x13c   :  { %v78_v34 = vmul.f32 %v2160_v33, %v62_v17 }
 0x13e   :  { %2022 = vmatmul.mubr.msk.f32.vlgmr.msra.gmra.mxu0 %vm51_vm0, %v78_v34 }
 0x13f   :  { %2043 = vmatpush3.msra.mxu0 %v2400_v45 }
 0x140   :  { %2044 = vmatprep.subr.mxu0 %v2405_v46 }
 0x141   :  { %2045 = vmatpush3.msra.mxu0 %v2405_v46 }
 0x142   :  { %2046 = vmatprep.subr.mxu0 %v2413_v47 }
 0x143   :  { %2047 = vmatpush3.msra.mxu0 %v2413_v47 }
 0x144   :  { %2048 = vmatprep.subr.mxu0 %v2420_v48 }
 0x145   :  { %2049 = vmatpush3.msra.mxu0 %v2420_v48 }
 0x1fe   :  { %v2342_v36 = vpop.f32.mrf.mxu0 }
 0x1ff   :  { %214 = vrot.lane.b32.xlu0 %v2342_v36, %s2236_s7 }
 0x200   :  { %v2346_v37 = vpop.f32.mrf.mxu0 }
 0x201   :  { %212 = vrot.lane.b32.xlu1 %v2346_v37, %s2236_s7 }
 0x271   :  { %v215_v38 = vpop.permute.xlu0 %214 }
 0x272   :  { %2024 = vmatprep.subr.mxu1 %v215_v38 }
 0x273   :  { %2025 = vmatpush3.msra.mxu1 %v215_v38  ;;  %v213_v39 = vpop.permute.xlu1 %212 }
 0x274   :  { %2026 = vmatprep.subr.mxu1 %v213_v39 }
 0x275   :  { %2027 = vmatpush3.msra.mxu1 %v213_v39  ;;  %v165_v39 = vrot.slane %v2346_v37, 7 }
 0x276   :  { %2029 = vmatmul.mubr.msk.f32.vlgmr.msra.gmra.mxu1 %vm218_vm1, %v2353_v40  ;;  %2031 = vmatprep.subr.mxu1 %v2358_v41 }
 0x277   :  { %2032 = vmatpush3.msra.mxu1 %v2358_v41  ;;  %2039 = vmatprep.mubr.msk.f32.mxu1 %vm51_vm0, %v2293_v7 }
 0x278   :  { %2033 = vmatprep.subr.mxu1 %v2363_v42 }
 0x279   :  { %2034 = vmatpush3.msra.mxu1 %v2363_v42 }
 0x27a   :  { %2035 = vmatprep.subr.mxu1 %v2372_v43 }
 0x27b   :  { %2036 = vmatpush3.msra.mxu1 %v2372_v43 }
 0x27c   :  { %2037 = vmatprep.subr.mxu1 %v2381_v44 }
 0x27d   :  { %2038 = vmatpush3.msra.mxu1 %v2381_v44 }
 0x27e   :  { %2040 = vmatmul.mubr.msk.f32.vlgmr.msra.gmra.mxu1 %vm51_vm0, %v2295_v8  ;;  %2053 = vmatprep.subr.mxu1 %v2308_v21 }
 0x27f   :  { %2054 = vmatpush3.msra.mxu1 %v2308_v21 }
 0x280   :  { %2055 = vmatprep.subr.mxu1 %v2313_v22 }
 0x281   :  { %2056 = vmatpush3.msra.mxu1 %v2313_v22 }
 0x282   :  { %2057 = vmatprep.subr.mxu1 %v2320_v23 }
 0x283   :  { %2058 = vmatpush3.msra.mxu1 %v2320_v23 }
 0x284   :  { %2059 = vmatprep.subr.mxu1 %v2329_v24 }
 0x285   :  { %2060 = vmatpush3.msra.mxu1 %v2329_v24 }
 0x286   :  { %2082 = vmatprep.subr.mxu1 %v2400_v45 }
 0x336   :  { %v2426_v49 = vpop.f32.mrf.mxu1 }
 0x338   :  { %v2429_v51 = vpop.f32.mrf.mxu1 }
 0x33e   :  { %v2041_v53 = vpop.f32.mrf.mxu1 }
 0x33f   :  { %v412_v54 = vadd.f32 %v2041_v53, %v2432_v52  ;;  %v161_v53 = vrot.slane %v2342_v36, 7 }
 0x340   :  { %v406_v55 = vpop.f32.mrf.mxu1 }
 0x341   :  { %v407_v56 = vadd.f32 %v406_v55, %v2432_v52  ;;  %v166_v60 = vsel %vm164_vm2, %v165_v39, %v161_v53 }
 0x343   :  { %2161 = vtanh.f32 %v407_v56  ;;  %v188_v56 = vrot.slane %v2342_v36, 1 }
 0x344   :  { %2163 = vtanh.f32 %v412_v54  ;;  %v187_v54 = vrot.slane %v2346_v37, 1 }
 0x346   :  { %v192_v59 = vsel %vm186_vm3, %v188_v56, %v187_v54 }
 0x350   :  { %v2162_v57 = vpop.eup %2161 }
 0x351   :  { %v2164_v58 = vpop.eup %2163  ;;  %2050 = vmatprep.mubr.msk.f32.mxu0 %vm51_vm0, %v2162_v57  ;;  %v168_v57 = vsel %vm164_vm2, %v161_v53, %v165_v39 }
 0x352   :  { %2051 = vmatmul.mubr.msk.f32.vlgmr.msra.gmra.mxu0 %vm51_vm0, %v2164_v58  ;;  %v189_v58 = vsel %vm186_vm3, %v187_v54, %v188_v56 }
 0x353   :  { %2068 = vmatprep.mubr.msk.f32.mxu0 %vm218_vm1, %v2338_v35 }
 0x412   :  { %v2052_v62 = vpop.f32.mrf.mxu0 }
 0x413   :  { %v499_v63 = vadd.f32 %v2052_v62, %v2295_v8 }
 0x414   :  { %v489_v4 = vpop.f32.mrf.mxu0 }
 0x415   :  { %v2448_v5 = vadd.f32 %v2443_v61, %v499_v63  ;;  %v498_v6 = vadd.f32 %v489_v4, %v2293_v7 }
 0x417   :  { %550 = vst.msk [vmem:[#allocation2 + $0x8] sm:$0xff] %vm51_vm0, %v2448_v5  ;;  %v2454_v9 = vadd.f32 %v573_v3, %v2448_v5  ;;  %v2457_v10 = vadd.f32 %v2443_v61, %v498_v6 }
 0x419   :  { %549 = vst.msk [vmem:[#allocation2] sm:$0xff] %vm51_vm0, %v2457_v10  ;;  %v2462_v8 = vadd.f32 %v573_v3, %v2457_v10  ;;  %v579_v11 = vsel %vm51_vm0, %v2454_v9, 0.0 }
 0x41a   :  { %580 = vadd.xlane.f32.xlu0 %v579_v11 }
 0x41b   :  { %v576_v7 = vsel %vm51_vm0, %v2462_v8, 0.0 }
 0x41c   :  { %577 = vadd.xlane.f32.xlu1 %v576_v7 }
 0x4a3   :  { %v581_v12 = vpop.xlane.xlu0 %580 }
 0x4a4   :  { %v583_v13 = vmul.f32 0.03125, %v581_v12 }
 0x4a5   :  { %v578_v14 = vpop.xlane.xlu1 %577 }
 0x4a6   :  { %v585_v15 = vsub.f32 %v2454_v9, %v583_v13  ;;  %v582_v16 = vmul.f32 0.03125, %v578_v14 }
 0x4a8   :  { %v584_v17 = vsub.f32 %v2462_v8, %v582_v16  ;;  %v587_v18 = vmul.f32 %v585_v15, %v585_v15 }
 0x4aa   :  { %v591_v19 = vsel %vm51_vm0, %v587_v18, 0.0  ;;  %v586_v20 = vmul.f32 %v584_v17, %v584_v17 }
 0x4ab   :  { %592 = vadd.xlane.f32.xlu1 %v591_v19 }
 0x4ac   :  { %v588_v25 = vsel %vm51_vm0, %v586_v20, 0.0 }
 0x4ad   :  { %589 = vadd.xlane.f32.xlu0 %v588_v25 }
 0x534   :  { %v593_v26 = vpop.xlane.xlu1 %592 }
 0x535   :  { %v595_v27 = vmul.f32 0.03125, %v593_v26 }
 0x536   :  { %v590_v28 = vpop.xlane.xlu0 %589 }
 0x537   :  { %v597_v29 = vadd.f32 1e-05, %v595_v27  ;;  %v594_v30 = vmul.f32 0.03125, %v590_v28 }
 0x539   :  { %v596_v31 = vadd.f32 1e-05, %v594_v30  ;;  %2165 = vrsqrt.f32 %v597_v29 }
 0x53b   :  { %2167 = vrsqrt.f32 %v596_v31 }
 0x546   :  { %v2166_v32 = vpop.eup %2165 }
 0x547   :  { %v601_v38 = vmul.f32 %v2166_v32, %v585_v15 }
 0x548   :  { %v2168_v33 = vpop.eup %2167 }
 0x549   :  { %v600_v34 = vmul.f32 %v2168_v33, %v584_v17 }
 0x54b   :  { %2061 = vmatprep.mubr.msk.f32.mxu1 %vm51_vm0, %v600_v34 }
 0x54c   :  { %2062 = vmatmul.mubr.msk.f32.vlgmr.msra.gmra.mxu1 %vm51_vm0, %v601_v38  ;;  %v2242_v38 = vmov 0.0  }
 0x54d   :  { %2083 = vmatpush3.msra.mxu1 %v2400_v45 }
 0x54e   :  { %2084 = vmatprep.subr.mxu1 %v2405_v46 }
 0x54f   :  { %2085 = vmatpush3.msra.mxu1 %v2405_v46 }
 0x550   :  { %2086 = vmatprep.subr.mxu1 %v2413_v47 }
 0x551   :  { %2087 = vmatpush3.msra.mxu1 %v2413_v47 }
 0x552   :  { %2088 = vmatprep.subr.mxu1 %v2420_v48 }
 0x553   :  { %2089 = vmatpush3.msra.mxu1 %v2420_v48 }
 0x60c   :  { %v2482_v50 = vpop.f32.mrf.mxu1 }
 0x60d   :  { %735 = vrot.lane.b32.xlu0 %v2482_v50, %s2236_s7 }
 0x60e   :  { %v2488_v55 = vpop.f32.mrf.mxu1 }
 0x60f   :  { %733 = vrot.lane.b32.xlu1 %v2488_v55, %s2236_s7 }
 0x611   :  { %170 = vrot.lane.b32.xlu0 %v168_v57, %s2237_s25 }
 0x613   :  { %194 = vrot.lane.b32.xlu1 %v189_v58, %s2238_s26 }
 0x615   :  { %178 = vrot.lane.b32.xlu0 %v2346_v37, %s2238_s26 }
 0x617   :  { %196 = vrot.lane.b32.xlu1 %v192_v59, %s2238_s26 }
 0x61b   :  { %172 = vrot.lane.b32.xlu1 %v166_v60, %s2237_s25 }
 0x61f   :  { %180 = vrot.lane.b32.xlu1 %v2342_v36, %s2238_s26 }
 0x67f   :  { %v736_v62 = vpop.permute.xlu0 %735 }
 0x680   :  { %2064 = vmatprep.subr.mxu0 %v736_v62 }
 0x681   :  { %2065 = vmatpush3.msra.mxu0 %v736_v62  ;;  %v734_v63 = vpop.permute.xlu1 %733 }
 0x682   :  { %2066 = vmatprep.subr.mxu0 %v734_v63 }
 0x683   :  { %2067 = vmatpush3.msra.mxu0 %v734_v63 }
 0x684   :  { %2069 = vmatmul.mubr.msk.f32.vlgmr.msra.gmra.mxu0 %vm218_vm1, %v2353_v40  ;;  %2071 = vmatprep.subr.mxu0 %v2358_v41 }
 0x685   :  { %2072 = vmatpush3.msra.mxu0 %v2358_v41  ;;  %2079 = vmatprep.mubr.msk.f32.mxu0 %vm51_vm0, %v2462_v8  ;;  %v195_v37 = vpop.permute.xlu1 %194 }
 0x686   :  { %v200_v3 = vmul.f32 %v195_v37, %v2338_v35  ;;  %2073 = vmatprep.subr.mxu0 %v2363_v42 }
 0x687   :  { %2074 = vmatpush3.msra.mxu0 %v2363_v42 }
 0x688   :  { %2075 = vmatprep.subr.mxu0 %v2372_v43  ;;  %204 = vrot.lane.b32.xlu0 %v200_v3, %s2239_s27 }
 0x689   :  { %2076 = vmatpush3.msra.mxu0 %v2372_v43  ;;  %v197_v36 = vpop.permute.xlu1 %196 }
 0x68a   :  { %v201_v4 = vmul.f32 %v197_v36, %v2353_v40  ;;  %2077 = vmatprep.subr.mxu0 %v2381_v44 }
 0x68b   :  { %2078 = vmatpush3.msra.mxu0 %v2381_v44 }
 0x68c   :  { %2080 = vmatmul.mubr.msk.f32.vlgmr.msra.gmra.mxu0 %vm51_vm0, %v2454_v9  ;;  %302 = vrot.lane.b32.xlu0 %v2429_v51, %s2237_s25  ;;  %v171_v51 = vpop.permute.xlu0 %170 }
 0x68d   :  { %206 = vrot.lane.b32.xlu1 %v201_v4, %s2239_s27  ;;  %2093 = vmatprep.subr.mxu0 %v2308_v21 }
 0x68e   :  { %2094 = vmatpush3.msra.mxu0 %v2308_v21  ;;  %v2241_v21 = vmov 17  }
 0x68f   :  { %2095 = vmatprep.subr.mxu0 %v2313_v22  ;;  %2155 = vset.pattern.permute.xlu0 %v2241_v21 }
 0x690   :  { %310 = vrot.lane.b32.xlu0 %v2338_v35, %s2240_s28  ;;  %2096 = vmatpush3.msra.mxu0 %v2313_v22  ;;  %v173_v22 = vpop.permute.xlu1 %172  ;;  %v179_v6 = vpop.permute.xlu0 %178 }
 0x691   :  { %304 = vrot.lane.b32.xlu1 %v2426_v49, %s2237_s25  ;;  %2097 = vmatprep.subr.mxu0 %v2320_v23  ;;  %v176_v49 = vmul.f32 %v171_v51, %v2338_v35 }
 0x692   :  { %2098 = vmatpush3.msra.mxu0 %v2320_v23  ;;  %2156 = vset.pattern.permute.xlu1 %v2241_v21 }
 0x693   :  { %2099 = vmatprep.subr.mxu0 %v2329_v24  ;;  %v184_v12 = vadd.f32 %v179_v6, %v176_v49 }
 0x694   :  { %2100 = vmatpush3.msra.mxu0 %v2329_v24  ;;  %v181_v7 = vpop.permute.xlu1 %180  ;;  %v177_v24 = vmul.f32 %v173_v22, %v2353_v40 }
 0x695   :  { %312 = vrot.lane.b32.xlu1 %v2353_v40, %s2240_s28  ;;  %2122 = vmatprep.subr.mxu0 %v2400_v45 }
 0x696   :  { %v185_v16 = vadd.f32 %v181_v7, %v177_v24 }
 0x6fa   :  { %v205_v11 = vpop.permute.xlu0 %204 }
 0x6fb   :  { %v210_v13 = vadd.f32 %v205_v11, %v184_v12 }
 0x6fe   :  { %v303_v23 = vpop.permute.xlu0 %302 }
 0x6ff   :  { %v207_v14 = vpop.permute.xlu1 %206  ;;  %v308_v15 = vadd.f32 %v303_v23, %v210_v13 }
 0x700   :  { %v211_v20 = vadd.f32 %v207_v14, %v185_v16 }
 0x702   :  { %v2540_v17 = vpop.permute.xlu0 %310 }
 0x703   :  { %v316_v18 = vadd.f32 %v2540_v17, %v308_v15  ;;  %v305_v19 = vpop.permute.xlu1 %304 }
 0x704   :  { %v309_v26 = vadd.f32 %v305_v19, %v211_v20  ;;  %v2243_v19 = vmov 0  }
 0x705   :  { %v1913_v25 = vmul.f32 -1.442695, %v316_v18 }
 0x707   :  { %2169 = vpow2.f32 %v1913_v25  ;;  %v2543_v27 = vpop.permute.xlu1 %312 }
 0x708   :  { %v317_v28 = vadd.f32 %v2543_v27, %v309_v26 }
 0x70a   :  { %v1914_v29 = vmul.f32 -1.442695, %v317_v28 }
 0x70c   :  { %2171 = vpow2.f32 %v1914_v29 }
 0x714   :  { %v2170_v30 = vpop.eup %2169 }
 0x715   :  { %v324_v31 = vadd.f32 1.0, %v2170_v30 }
 0x717   :  { %2173 = vrcp.f32 %v324_v31 }
 0x719   :  { %v2172_v32 = vpop.eup %2171 }
 0x71a   :  { %v325_v33 = vadd.f32 1.0, %v2172_v32 }
 0x71c   :  { %2175 = vrcp.f32 %v325_v33  ;;  %v1078_v33 = vsub.s32 5, %v2278_v1 }
 0x724   :  { %v2174_v34 = vpop.eup %2173 }
 0x725   :  { %vm516_vm4 = vcmp.le.f32.partialorder %v2174_v34, 0.99  ;;  %vm512_vm5 = vcmp.gt.f32.partialorder %v2174_v34, 0.99 }
 0x726   :  { %v518_v39 = vsel %vm516_vm4, 1.0, %v2242_v38  ;;  %v514_v57 = vsel %vm512_vm5, 1.0, %v2242_v38 }
 0x727   :  { %v520_v53 = vmul.f32 %v2174_v34, %v518_v39  ;;  %v2552_v63 = vadd.f32 %v518_v39, %v514_v57 }
 0x729   :  { %v2176_v54 = vpop.eup %2175  ;;  %v524_v56 = vsub.f32 1.0, %v520_v53  ;;  %vm553_vm9 = vcmp.lt.f32.partialorder %v2552_v63, 3.0 }
 0x72a   :  { %vm517_vm6 = vcmp.le.f32.partialorder %v2176_v54, 0.99  ;;  %vm513_vm7 = vcmp.gt.f32.partialorder %v2176_v54, 0.99 }
 0x72b   :  { %v2548_v58 = vmul.f32 %v524_v56, %v514_v57  ;;  %v519_v59 = vsel %vm517_vm6, 1.0, %v2242_v38  ;;  %v515_v36 = vsel %vm513_vm7, 1.0, %v2242_v38 }
 0x72c   :  { %v521_v60 = vmul.f32 %v2176_v54, %v519_v59  ;;  %v2561_v51 = vadd.f32 %v519_v59, %v515_v36  ;;  %v1079_v54 = vrot.slane %v2283_v2, %v1078_v33  ;;  %v687_v33 = vrot.slane %v2488_v55, 7 }
 0x72d   :  { %v530_v62 = vmul.f32 %v2548_v58, %v514_v57 }
 0x72e   :  { %v525_v37 = vsub.f32 1.0, %v521_v60  ;;  %vm554_vm12 = vcmp.lt.f32.partialorder %v2561_v51, 3.0 }
 0x72f   :  { %v2554_v3 = vadd.f32 %v530_v62, %v520_v53 }
 0x730   :  { %v2557_v4 = vmul.f32 %v525_v37, %v515_v36 }
 0x731   :  { %vm551_vm8 = vcmp.lt.f32.partialorder %v2554_v3, 0.99 }
 0x732   :  { %v531_v21 = vmul.f32 %v2557_v4, %v515_v36  ;;  %vm555_vm10 = vmand %vm551_vm8, %vm553_vm9 }
 0x733   :  { %v557_v6 = vsel %vm555_vm10, 1.0, %v2242_v38 }
 0x734   :  { %v2564_v22 = vadd.f32 %v531_v21, %v521_v60  ;;  %v560_v49 = vsel %vm559_vm13, %v557_v6, -inf }
 0x736   :  { %vm552_vm11 = vcmp.lt.f32.partialorder %v2564_v22, 0.99 }
 0x737   :  { %vm556_vm14 = vmand %vm552_vm11, %vm554_vm12 }
 0x738   :  { %v558_v11 = vsel %vm556_vm14, 1.0, %v2242_v38 }
 0x739   :  { %v561_v7 = vsel %vm559_vm13, %v558_v11, -inf }
 0x73a   :  { %v562_v12 = vmax.f32 %v560_v49, %v561_v7 }
 0x73c   :  { %v563_v23 = vrot.slane %v562_v12, 4 }
 0x73e   :  { %v564_v13 = vmax.f32 %v562_v12, %v563_v23 }
 0x740   :  { %v565_v14 = vrot.slane %v564_v13, 2 }
 0x742   :  { %v566_v24 = vmax.f32 %v564_v13, %v565_v14 }
 0x744   :  { %v567_v15 = vrot.slane %v566_v24, 1  ;;  %v2572_v16 = vpop.f32.mrf.mxu0 }
 0x746   :  { %v2574_v18 = vmax.f32 %v566_v24, %v567_v15  ;;  %v2580_v25 = vpop.f32.mrf.mxu0 }
 0x748   :  { %vm569_vm15 = vcmp.gt.f32.partialorder %v2574_v18, 0.5 }
 0x749   :  { %v1040_v20 = vsel %vm569_vm15, 1, %v2243_v19 }
 0x74a   :  { %1042 = vperm.xlu0 %2155, %v1040_v20  }
 0x74c   :  { %v2081_v26 = vpop.f32.mrf.mxu0 }
 0x74d   :  { %v916_v28 = vadd.f32 %v2081_v26, %v2432_v52 }
 0x74e   :  { %v910_v29 = vpop.f32.mrf.mxu0 }
 0x74f   :  { %v911_v30 = vadd.f32 %v910_v29, %v2432_v52 }
 0x751   :  { %2177 = vtanh.f32 %v911_v30 }
 0x752   :  { %2179 = vtanh.f32 %v916_v28 }
 0x75e   :  { %v2178_v31 = vpop.eup %2177 }
 0x75f   :  { %v2180_v32 = vpop.eup %2179  ;;  %2090 = vmatprep.mubr.msk.f32.mxu1 %vm51_vm0, %v2178_v31 }
 0x760   :  { %2091 = vmatmul.mubr.msk.f32.vlgmr.msra.gmra.mxu1 %vm51_vm0, %v2180_v32 }
 0x761   :  { %2108 = vmatprep.mubr.msk.f32.mxu1 %vm218_vm1, %v2338_v35 }
 0x7c5   :  { %v1043_v39 = vpop.permute.xlu0 %1042 }
 0x7c6   :  { %vm1044_vm4 = vcmp.eq.s32.totalorder %v1043_v39, 1  ;;  %v708_v39 = vrot.slane %v2488_v55, 1 }
 0x820   :  { %v2092_v34 = vpop.f32.mrf.mxu1 }
 0x821   :  { %v1003_v53 = vadd.f32 %v2092_v34, %v2454_v9 }
 0x822   :  { %v993_v56 = vpop.f32.mrf.mxu1 }
 0x823   :  { %v1005_v57 = vadd.f32 %v1003_v53, %v2443_v61  ;;  %v1002_v59 = vadd.f32 %v993_v56, %v2462_v8 }
 0x825   :  { %v2594_v60 = vsel %vm1044_vm4, %v1005_v57, %v2448_v5  ;;  %1057 = vst.msk [vmem:[#allocation2 + $0x18] sm:$0xff] %vm51_vm0, %v1005_v57  ;;  %v1004_v62 = vadd.f32 %v1002_v59, %v2443_v61 }
 0x826   :  { %v2599_v37 = vadd.f32 %v1079_v54, %v2594_v60 }
 0x827   :  { %v2602_v9 = vsel %vm1044_vm4, %v1004_v62, %v2457_v10  ;;  %1056 = vst.msk [vmem:[#allocation2 + $0x10] sm:$0xff] %vm51_vm0, %v1004_v62 }
 0x828   :  { %v2606_v2 = vadd.f32 %v1079_v54, %v2602_v9  ;;  %v1085_v8 = vsel %vm51_vm0, %v2599_v37, 0.0 }
 0x829   :  { %1086 = vadd.xlane.f32.xlu0 %v1085_v8 }
 0x82a   :  { %v1082_v5 = vsel %vm51_vm0, %v2606_v2, 0.0 }
 0x82b   :  { %1083 = vadd.xlane.f32.xlu1 %v1082_v5 }
 0x8b2   :  { %v1087_v36 = vpop.xlane.xlu0 %1086 }
 0x8b3   :  { %v1089_v21 = vmul.f32 0.03125, %v1087_v36 }
 0x8b4   :  { %v1084_v6 = vpop.xlane.xlu1 %1083 }
 0x8b5   :  { %v1091_v11 = vsub.f32 %v2599_v37, %v1089_v21  ;;  %v1088_v10 = vmul.f32 0.03125, %v1084_v6 }
 0x8b7   :  { %v1090_v49 = vsub.f32 %v2606_v2, %v1088_v10  ;;  %v1093_v7 = vmul.f32 %v1091_v11, %v1091_v11 }
 0x8b9   :  { %v1097_v12 = vsel %vm51_vm0, %v1093_v7, 0.0  ;;  %v1092_v23 = vmul.f32 %v1090_v49, %v1090_v49 }
 0x8ba   :  { %1098 = vadd.xlane.f32.xlu1 %v1097_v12 }
 0x8bb   :  { %v1094_v13 = vsel %vm51_vm0, %v1092_v23, 0.0 }
 0x8bc   :  { %1095 = vadd.xlane.f32.xlu0 %v1094_v13 }
 0x943   :  { %v1099_v14 = vpop.xlane.xlu1 %1098 }
 0x944   :  { %v1101_v24 = vmul.f32 0.03125, %v1099_v14 }
 0x945   :  { %v1096_v15 = vpop.xlane.xlu0 %1095 }
 0x946   :  { %v1103_v20 = vadd.f32 1e-05, %v1101_v24  ;;  %v1100_v26 = vmul.f32 0.03125, %v1096_v15 }
 0x948   :  { %v1102_v28 = vadd.f32 1e-05, %v1100_v26  ;;  %2181 = vrsqrt.f32 %v1103_v20 }
 0x94a   :  { %2183 = vrsqrt.f32 %v1102_v28 }
 0x955   :  { %v2182_v29 = vpop.eup %2181 }
 0x956   :  { %v1107_v32 = vmul.f32 %v2182_v29, %v1091_v11 }
 0x957   :  { %v2184_v30 = vpop.eup %2183 }
 0x958   :  { %v1106_v31 = vmul.f32 %v2184_v30, %v1090_v49 }
 0x95a   :  { %2101 = vmatprep.mubr.msk.f32.mxu0 %vm51_vm0, %v1106_v31 }
 0x95b   :  { %2102 = vmatmul.mubr.msk.f32.vlgmr.msra.gmra.mxu0 %vm51_vm0, %v1107_v32 }
 0x95c   :  { %2123 = vmatpush3.msra.mxu0 %v2400_v45  ;;  %v684_v45 = vrot.slane %v2482_v50, 7 }
 0x95d   :  { %2124 = vmatprep.subr.mxu0 %v2405_v46 }
 0x95e   :  { %2125 = vmatpush3.msra.mxu0 %v2405_v46  ;;  %v690_v54 = vsel %vm164_vm2, %v684_v45, %v687_v33  ;;  %v688_v62 = vsel %vm164_vm2, %v687_v33, %v684_v45 }
 0x95f   :  { %2126 = vmatprep.subr.mxu0 %v2413_v47 }
 0x960   :  { %2127 = vmatpush3.msra.mxu0 %v2413_v47 }
 0x961   :  { %2128 = vmatprep.subr.mxu0 %v2420_v48 }
 0x962   :  { %2129 = vmatpush3.msra.mxu0 %v2420_v48  ;;  %v709_v48 = vrot.slane %v2482_v50, 1 }
 0x964   :  { %v710_v57 = vsel %vm186_vm3, %v708_v39, %v709_v48  ;;  %v713_v59 = vsel %vm186_vm3, %v709_v48, %v708_v39 }
 0xa1b   :  { %v2626_v34 = vpop.f32.mrf.mxu0 }
 0xa1c   :  { %1241 = vrot.lane.b32.xlu0 %v2626_v34, %s2236_s7  ;;  %v1215_v53 = vrot.slane %v2626_v34, 1 }
 0xa1d   :  { %v2632_v46 = vpop.f32.mrf.mxu0 }
 0xa1e   :  { %v1214_v47 = vrot.slane %v2632_v46, 1  ;;  %1239 = vrot.lane.b32.xlu1 %v2632_v46, %s2236_s7 }
 0xa20   :  { %692 = vrot.lane.b32.xlu0 %v690_v54, %s2237_s25  ;;  %v2642_v56 = vsel %vm186_vm3, %v1215_v53, %v1214_v47 }
 0xa22   :  { %715 = vrot.lane.b32.xlu1 %v710_v57, %s2238_s26 }
 0xa24   :  { %700 = vrot.lane.b32.xlu0 %v2488_v55, %s2238_s26 }
 0xa26   :  { %717 = vrot.lane.b32.xlu1 %v713_v59, %s2238_s26 }
 0xa2a   :  { %694 = vrot.lane.b32.xlu1 %v688_v62, %s2237_s25 }
 0xa2e   :  { %702 = vrot.lane.b32.xlu1 %v2482_v50, %s2238_s26 }
 0xa8e   :  { %v1242_v8 = vpop.permute.xlu0 %1241 }
 0xa8f   :  { %2104 = vmatprep.subr.mxu1 %v1242_v8 }
 0xa90   :  { %2105 = vmatpush3.msra.mxu1 %v1242_v8  ;;  %v1240_v5 = vpop.permute.xlu1 %1239 }
 0xa91   :  { %2106 = vmatprep.subr.mxu1 %v1240_v5 }
 0xa92   :  { %2107 = vmatpush3.msra.mxu1 %v1240_v5 }
 0xa93   :  { %2109 = vmatmul.mubr.msk.f32.vlgmr.msra.gmra.mxu1 %vm218_vm1, %v2353_v40  ;;  %2111 = vmatprep.subr.mxu1 %v2358_v41  ;;  %vm1006_vm1 = vcmp.lt.f32.partialorder %v2554_v3, 1.0 }
 0xa94   :  { %2112 = vmatpush3.msra.mxu1 %v2358_v41  ;;  %2119 = vmatprep.mubr.msk.f32.mxu1 %vm51_vm0, %v2606_v2  ;;  %v716_v55 = vpop.permute.xlu1 %715  ;;  %v1216_v41 = vsel %vm186_vm3, %v1214_v47, %v1215_v53  ;;  %v1008_v33 = vsel %vm1006_vm1, 1.0, %v2242_v38  ;;  %vm1007_vm3 = vcmp.lt.f32.partialorder %v2564_v22, 1.0 }
 0xa95   :  { %v721_v36 = vmul.f32 %v716_v55, %v2338_v35  ;;  %2113 = vmatprep.subr.mxu1 %v2363_v42  ;;  %v1009_v47 = vsel %vm1007_vm3, 1.0, %v2242_v38 }
 0xa96   :  { %2114 = vmatpush3.msra.mxu1 %v2363_v42  ;;  %v693_v42 = vpop.permute.xlu0 %692 }
 0xa97   :  { %2115 = vmatprep.subr.mxu1 %v2372_v43  ;;  %725 = vrot.lane.b32.xlu0 %v721_v36, %s2239_s27 }
 0xa98   :  { %2116 = vmatpush3.msra.mxu1 %v2372_v43  ;;  %v718_v50 = vpop.permute.xlu1 %717 }
 0xa99   :  { %v722_v21 = vmul.f32 %v718_v50, %v2353_v40  ;;  %2117 = vmatprep.subr.mxu1 %v2381_v44 }
 0xa9a   :  { %2118 = vmatpush3.msra.mxu1 %v2381_v44  ;;  %v701_v6 = vpop.permute.xlu0 %700  ;;  %v698_v44 = vmul.f32 %v693_v42, %v2338_v35 }
 0xa9b   :  { %2120 = vmatmul.mubr.msk.f32.vlgmr.msra.gmra.mxu1 %vm51_vm0, %v2599_v37  ;;  %816 = vrot.lane.b32.xlu0 %v2580_v25, %s2237_s25 }
 0xa9c   :  { %727 = vrot.lane.b32.xlu1 %v722_v21, %s2239_s27  ;;  %v695_v43 = vpop.permute.xlu1 %694  ;;  %v706_v10 = vadd.f32 %v701_v6, %v698_v44 }
 0xa9d   :  { %v699_v25 = vmul.f32 %v695_v43, %v2353_v40 }
 0xaa0   :  { %818 = vrot.lane.b32.xlu1 %v2572_v16, %s2237_s25  ;;  %v703_v49 = vpop.permute.xlu1 %702 }
 0xaa1   :  { %v707_v14 = vadd.f32 %v703_v49, %v699_v25 }
 0xaa4   :  { %1221 = vrot.lane.b32.xlu1 %v1216_v41, %s2238_s26 }
 0xb09   :  { %v726_v11 = vpop.permute.xlu0 %725 }
 0xb0a   :  { %v731_v7 = vadd.f32 %v726_v11, %v706_v10 }
 0xb0d   :  { %v817_v12 = vpop.permute.xlu0 %816 }
 0xb0e   :  { %v822_v23 = vadd.f32 %v817_v12, %v731_v7  ;;  %v728_v13 = vpop.permute.xlu1 %727 }
 0xb0f   :  { %v732_v24 = vadd.f32 %v728_v13, %v707_v14 }
 0xb10   :  { %v824_v16 = vadd.f32 %v822_v23, %v2540_v17 }
 0xb12   :  { %v1923_v15 = vmul.f32 -1.442695, %v824_v16  ;;  %v819_v20 = vpop.permute.xlu1 %818 }
 0xb13   :  { %v823_v26 = vadd.f32 %v819_v20, %v732_v24 }
 0xb14   :  { %2185 = vpow2.f32 %v1923_v15 }
 0xb15   :  { %v825_v28 = vadd.f32 %v823_v26, %v2543_v27 }
 0xb17   :  { %v1924_v35 = vmul.f32 -1.442695, %v825_v28 }
 0xb19   :  { %2187 = vpow2.f32 %v1924_v35 }
 0xb21   :  { %v2186_v29 = vpop.eup %2185 }
 0xb22   :  { %v832_v30 = vadd.f32 1.0, %v2186_v29 }
 0xb24   :  { %2189 = vrcp.f32 %v832_v30 }
 0xb26   :  { %v2188_v31 = vpop.eup %2187 }
 0xb27   :  { %v833_v40 = vadd.f32 1.0, %v2188_v31 }
 0xb29   :  { %2191 = vrcp.f32 %v833_v40 }
 0xb31   :  { %v2190_v32 = vpop.eup %2189 }
 0xb32   :  { %v1010_v45 = vmul.f32 %v2190_v32, %v1008_v33 }
 0xb34   :  { %v1012_v39 = vadd.f32 %v1010_v45, %v2554_v3  ;;  %v1054_v45 = vadd.f32 1.0, %v2574_v18 }
 0xb36   :  { %v2192_v53 = vpop.eup %2191  ;;  %vm1018_vm5 = vcmp.le.f32.partialorder %v1012_v39, 0.99  ;;  %vm1014_vm6 = vcmp.gt.f32.partialorder %v1012_v39, 0.99 }
 0xb37   :  { %v1020_v48 = vsel %vm1018_vm5, %v1008_v33, 0.0  ;;  %v1011_v54 = vmul.f32 %v2192_v53, %v1009_v47  ;;  %v1016_v55 = vsel %vm1014_vm6, %v1008_v33, 0.0 }
 0xb38   :  { %v1022_v57 = vmul.f32 %v2190_v32, %v1020_v48  ;;  %v1036_v36 = vadd.f32 %v1020_v48, %v2552_v63 }
 0xb39   :  { %v1013_v59 = vadd.f32 %v1011_v54, %v2564_v22 }
 0xb3a   :  { %v1024_v62 = vadd.f32 %v1022_v57, %v2554_v3  ;;  %v1038_v43 = vadd.f32 %v1036_v36, %v1016_v55 }
 0xb3b   :  { %vm1019_vm7 = vcmp.le.f32.partialorder %v1013_v59, 0.99  ;;  %vm1015_vm8 = vcmp.gt.f32.partialorder %v1013_v59, 0.99 }
 0xb3c   :  { %v1026_v8 = vsub.f32 1.0, %v1024_v62  ;;  %v1021_v5 = vsel %vm1019_vm7, %v1009_v47, 0.0  ;;  %v1017_v10 = vsel %vm1015_vm8, %v1009_v47, 0.0  ;;  %v2699_v25 = vsel %vm569_vm15, %v1038_v43, %v2552_v63 }
 0xb3d   :  { %v1023_v50 = vmul.f32 %v2192_v53, %v1021_v5  ;;  %v1037_v44 = vadd.f32 %v1021_v5, %v2561_v51  ;;  %vm1060_vm10 = vcmp.lt.f32.partialorder %v2699_v25, 3.0 }
 0xb3e   :  { %v1028_v21 = vmul.f32 %v1026_v8, %v1016_v55 }
 0xb3f   :  { %v1025_v41 = vadd.f32 %v1023_v50, %v2564_v22  ;;  %v1039_v23 = vadd.f32 %v1037_v44, %v1017_v10 }
 0xb40   :  { %v2692_v42 = vadd.f32 %v1028_v21, %v2548_v58 }
 0xb41   :  { %v1027_v6 = vsub.f32 1.0, %v1025_v41  ;;  %v2715_v63 = vsel %vm569_vm15, %v1039_v23, %v2561_v51  ;;  %v2777_v23 = vld [vmem:[#allocation2] sm:$0xff] }
 0xb42   :  { %v1032_v11 = vmul.f32 %v2692_v42, %v1016_v55  ;;  %vm1061_vm12 = vcmp.lt.f32.partialorder %v2715_v63, 3.0 }
 0xb43   :  { %v1029_v49 = vmul.f32 %v1027_v6, %v1017_v10 }
 0xb44   :  { %v1034_v7 = vadd.f32 %v1032_v11, %v1024_v62  ;;  %v29_v62 = vld [vmem:[%s2901_s1 + $0x40] sm:$0xff] }
 0xb45   :  { %v2702_v12 = vadd.f32 %v1029_v49, %v2557_v4  ;;  %v2774_v49 = vld [vmem:[#allocation2 + $0x8] sm:$0xff] }
 0xb46   :  { %v2707_v13 = vsel %vm569_vm15, %v1034_v7, %v2554_v3 }
 0xb47   :  { %v1033_v14 = vmul.f32 %v2702_v12, %v1017_v10  ;;  %vm1058_vm9 = vcmp.lt.f32.partialorder %v2707_v13, 0.99  ;;  %vm1512_vm6 = vcmp.lt.f32.partialorder %v2707_v13, 1.0 }
 0xb48   :  { %vm1062_vm11 = vmand %vm1058_vm9, %vm1060_vm10 }
 0xb49   :  { %v1035_v16 = vadd.f32 %v1033_v14, %v1025_v41  ;;  %v1064_v3 = vsel %vm1062_vm11, 1.0, %v2242_v38  ;;  %vm1852_vm11 = vcmask 1041408  }
 0xb4a   :  { %v1066_v20 = vsel %vm559_vm13, %v1064_v3, -inf }
 0xb4b   :  { %v2720_v24 = vsel %vm569_vm15, %v1035_v16, %v2564_v22 }
 0xb4c   :  { %vm1059_vm14 = vcmp.lt.f32.partialorder %v2720_v24, 0.99  ;;  %vm1513_vm5 = vcmp.lt.f32.partialorder %v2720_v24, 1.0 }
 0xb4d   :  { %vm1063_vm4 = vmand %vm1059_vm14, %vm1061_vm12  ;;  %vm1854_vm12 = vcmask 1042432  }
 0xb4e   :  { %v1065_v15 = vsel %vm1063_vm4, 1.0, %v2242_v38 }
 0xb4f   :  { %v1067_v51 = vsel %vm559_vm13, %v1065_v15, -inf  ;;  %v2785_v15 = vld [vmem:[#allocation2 + $0x18] sm:$0xff] }
 0xb50   :  { %v1068_v26 = vmax.f32 %v1066_v20, %v1067_v51 }
 0xb52   :  { %v1069_v28 = vrot.slane %v1068_v26, 4 }
 0xb53   :  { %v2728_v29 = vpop.f32.mrf.mxu1 }
 0xb54   :  { %v1070_v35 = vmax.f32 %v1068_v26, %v1069_v28 }
 0xb55   :  { %v2730_v31 = vpop.f32.mrf.mxu1 }
 0xb56   :  { %v1071_v22 = vrot.slane %v1070_v35, 2 }
 0xb58   :  { %v1072_v30 = vmax.f32 %v1070_v35, %v1071_v22 }
 0xb5a   :  { %v1073_v40 = vrot.slane %v1072_v30, 1 }
 0xb5b   :  { %v2121_v32 = vpop.f32.mrf.mxu1 }
 0xb5c   :  { %v2732_v33 = vmax.f32 %v1072_v30, %v1073_v40  ;;  %v1422_v39 = vadd.f32 %v2121_v32, %v2432_v52  ;;  %v1193_v30 = vrot.slane %v2632_v46, 7  ;;  %v1190_v40 = vrot.slane %v2626_v34, 7 }
 0xb5d   :  { %v1416_v53 = vpop.f32.mrf.mxu1 }
 0xb5e   :  { %v1417_v47 = vadd.f32 %v1416_v53, %v2432_v52  ;;  %vm1075_vm1 = vcmp.gt.f32.partialorder %v2732_v33, 0.5  ;;  %v2739_v48 = vadd.f32 %v2732_v33, %v1054_v45  ;;  %v32_v52 = vld [vmem:[%s2901_s1 + $0x58] sm:$0xff]  ;;  %v1196_v32 = vsel %vm164_vm2, %v1190_v40, %v1193_v30  ;;  %v2803_v53 = vld [vmem:[%s2904_s3 + $0x8] sm:$0xff] }
 0xb5f   :  { %v1542_v54 = vsel %vm1075_vm1, 1, %v2243_v19  ;;  %2133 = vmatprep.subr.mxu1 %v32_v52  ;;  %v31_v19 = vld [vmem:[%s2901_s1 + $0x50] sm:$0xff] }
 0xb60   :  { %2193 = vtanh.f32 %v1417_v47  ;;  %1544 = vperm.xlu0 %2155, %v1542_v54   ;;  %2134 = vmatpush3.msra.mxu1 %v32_v52  ;;  %v1222_v52 = vpop.permute.xlu1 %1221 }
 0xb61   :  { %2195 = vtanh.f32 %v1422_v39  ;;  %2135 = vmatprep.subr.mxu1 %v31_v19  ;;  %v1194_v39 = vsel %vm164_vm2, %v1193_v30, %v1190_v40 }
 0xb62   :  { %2136 = vmatpush3.msra.mxu1 %v31_v19  ;;  %v2820_v19 = vld [vmem:[%s2904_s3] sm:$0xff]  ;;  %s2244_s3 = smov 64  }
 0xb64   :  { %1223 = vrot.lane.b32.xlu0 %v2642_v56, %s2238_s26  ;;  %v30_v56 = vld [vmem:[%s2901_s1 + $0x48] sm:$0xff] }
 0xb65   :  { %2137 = vmatprep.subr.mxu1 %v30_v56 }
 0xb66   :  { %2138 = vmatpush3.msra.mxu1 %v30_v56 }
 0xb67   :  { %2139 = vmatprep.subr.mxu1 %v29_v62 }
 0xb68   :  { %2140 = vmatpush3.msra.mxu1 %v29_v62 }
 0xb6d   :  { %v2194_v57 = vpop.eup %2193 }
 0xb6e   :  { %v2196_v59 = vpop.eup %2195  ;;  %2130 = vmatprep.mubr.msk.f32.mxu0 %vm51_vm0, %v2194_v57 }
 0xb6f   :  { %2131 = vmatmul.mubr.msk.f32.vlgmr.msra.gmra.mxu0 %vm51_vm0, %v2196_v59 }
 0xbdb   :  { %v1545_v36 = vpop.permute.xlu0 %1544 }
 0xbdc   :  { %vm1546_vm3 = vcmp.eq.s32.totalorder %v1545_v36, 1 }
 0xbdf   :  { %v1224_v45 = vpop.permute.xlu0 %1223 }
 0xbe0   :  { %v1228_v47 = vmul.f32 %v2803_v53, %v1224_v45 }
 0xc2f   :  { %v2132_v8 = vpop.f32.mrf.mxu0 }
 0xc30   :  { %v1509_v5 = vadd.f32 %v2132_v8, %v2599_v37  ;;  %v1560_v37 = vsub.s32 2, %v2278_v1 }
 0xc31   :  { %v1499_v55 = vpop.f32.mrf.mxu0 }
 0xc32   :  { %v1511_v50 = vadd.f32 %v1509_v5, %v2443_v61  ;;  %v1508_v21 = vadd.f32 %v1499_v55, %v2606_v2  ;;  %v2233_v2 = vld [vmem:[%s2901_s1 + $0x60] sm:$0x3f] }
 0xc33   :  { %v1561_v44 = vrot.slane %v2233_v2, %v1560_v37 }
 0xc34   :  { %1557 = vst.msk [vmem:[#allocation2 + $0x28] sm:$0xff] %vm51_vm0, %v1511_v50  ;;  %v1510_v41 = vadd.f32 %v1508_v21, %v2443_v61  ;;  %v1548_v6 = vsel %vm1546_vm3, %v1511_v50, %v2594_v60  ;;  %v2779_v60 = vld [vmem:[#allocation2 + $0x10] sm:$0xff] }
 0xc36   :  { %1556 = vst.msk [vmem:[#allocation2 + $0x20] sm:$0xff] %vm51_vm0, %v1510_v41  ;;  %v1547_v43 = vsel %vm1546_vm3, %v1510_v41, %v2602_v9 }
 0xc37   :  { %2141 = vmatprep.mubr.msk.f32.mxu1 %vm51_vm0, %v1547_v43 }
 0xc38   :  { %2142 = vmatmul.mubr.msk.f32.vlgmr.msra.gmra.mxu1 %vm51_vm0, %v1548_v6 }
 0xc3b   :  { %v2789_v26 = vld [vmem:[#allocation2 + $0x28] sm:$0xff] }
 0xc3d   :  { %v2809_v54 = vld [vmem:[#allocation2 + $0x20] sm:$0xff] }
 0xcf8   :  { %v2143_v11 = vpop.f32.mrf.mxu1 }
 0xcf9   :  { %v1640_v61 = vadd.f32 %v2143_v11, %v1561_v44 }
 0xcfa   :  { %v1634_v10 = vpop.f32.mrf.mxu1 }
 0xcfb   :  { %v1635_v7 = vadd.f32 %v1634_v10, %v1561_v44  ;;  %v1646_v9 = vmul.f32 %v2774_v49, %v1640_v61  ;;  %v1682_v51 = vmul.f32 %v2785_v15, %v1640_v61  ;;  %v1740_v35 = vmul.f32 %v2789_v26, %v1640_v61 }
 0xcfd   :  { %v1650_v14 = vsel %vm51_vm0, %v1646_v9, 0.0  ;;  %v1645_v1 = vmul.f32 %v2777_v23, %v1635_v7  ;;  %v1681_v16 = vmul.f32 %v2779_v60, %v1635_v7  ;;  %v1686_v28 = vsel %vm51_vm0, %v1682_v51, 0.0 }
 0xcfe   :  { %1651 = vadd.xlane.f32.xlu0 %v1650_v14  ;;  %v1744_v22 = vsel %vm51_vm0, %v1740_v35, 0.0  ;;  %v1739_v57 = vmul.f32 %v2809_v54, %v1635_v7 }
 0xcff   :  { %v1647_v3 = vsel %vm51_vm0, %v1645_v1, 0.0  ;;  %v1683_v20 = vsel %vm51_vm0, %v1681_v16, 0.0 }
 0xd00   :  { %1648 = vadd.xlane.f32.xlu1 %v1647_v3  ;;  %v1741_v59 = vsel %vm51_vm0, %v1739_v57, 0.0 }
 0xd02   :  { %1684 = vadd.xlane.f32.xlu0 %v1683_v20 }
 0xd06   :  { %1687 = vadd.xlane.f32.xlu0 %v1686_v28 }
 0xd0a   :  { %1745 = vadd.xlane.f32.xlu0 %v1744_v22 }
 0xd11   :  { %1198 = vrot.lane.b32.xlu1 %v1196_v32, %s2237_s25 }
 0xd20   :  { %1200 = vrot.lane.b32.xlu0 %v1194_v39, %s2237_s25 }
 0xd24   :  { %1233 = vrot.lane.b32.xlu0 %v1228_v47, %s2239_s27 }
 0xd28   :  { %1324 = vrot.lane.b32.xlu0 %v2728_v29, %s2237_s25  ;;  %v1227_v29 = vmul.f32 %v2820_v19, %v1222_v52 }
 0xd35   :  { %1742 = vadd.xlane.f32.xlu1 %v1741_v59 }
 0xd46   :  { %1206 = vrot.lane.b32.xlu1 %v2632_v46, %s2238_s26 }
 0xd4a   :  { %1208 = vrot.lane.b32.xlu1 %v2626_v34, %s2238_s26 }
 0xd4e   :  { %1231 = vrot.lane.b32.xlu1 %v1227_v29, %s2239_s27 }
 0xd52   :  { %1322 = vrot.lane.b32.xlu1 %v2730_v31, %s2237_s25 }
 0xd87   :  { %v1652_v56 = vpop.xlane.xlu0 %1651 }
 0xd88   :  { %v1656_v62 = vmax.f32 %v1652_v56, -1e+30 }
 0xd89   :  { %v1649_v8 = vpop.xlane.xlu1 %1648 }
 0xd8a   :  { %v1658_v46 = vsub.f32 -1e+30, %v1656_v62  ;;  %v1664_v5 = vsub.f32 %v1652_v56, %v1656_v62  ;;  %v1655_v55 = vmax.f32 %v1649_v8, -1e+30 }
 0xd8b   :  { %v1685_v36 = vpop.xlane.xlu0 %1684 }
 0xd8c   :  { %v1661_v34 = vmul.f32 1.442695, %v1658_v46  ;;  %v1667_v50 = vmul.f32 1.442695, %v1664_v5  ;;  %v1657_v21 = vsub.f32 -1e+30, %v1655_v55  ;;  %v1663_v41 = vsub.f32 %v1649_v8, %v1655_v55 }
 0xd8d   :  { %v1689_v43 = vsel %vm569_vm15, %v1685_v36, -1e+30 }
 0xd8e   :  { %2197 = vpow2.f32 %v1661_v34  ;;  %v1659_v6 = vmul.f32 1.442695, %v1657_v21  ;;  %v1665_v37 = vmul.f32 1.442695, %v1663_v41  ;;  %v1691_v2 = vmax.f32 %v1655_v55, %v1689_v43  ;;  %v1199_v34 = vpop.permute.xlu1 %1198 }
 0xd8f   :  { %2199 = vpow2.f32 %v1667_v50  ;;  %v1688_v31 = vpop.xlane.xlu0 %1687 }
 0xd90   :  { %2201 = vpow2.f32 %v1659_v6  ;;  %v1690_v44 = vsel %vm569_vm15, %v1688_v31, -1e+30  ;;  %v1699_v61 = vsub.f32 %v1689_v43, %v1691_v2  ;;  %v1693_v10 = vsub.f32 %v1655_v55, %v1691_v2 }
 0xd91   :  { %2203 = vpow2.f32 %v1665_v37  ;;  %v1692_v11 = vmax.f32 %v1656_v62, %v1690_v44 }
 0xd92   :  { %v1701_v51 = vmul.f32 1.442695, %v1699_v61  ;;  %v1695_v28 = vmul.f32 1.442695, %v1693_v10 }
 0xd93   :  { %v1694_v7 = vsub.f32 %v1656_v62, %v1692_v11  ;;  %v1700_v9 = vsub.f32 %v1690_v44, %v1692_v11  ;;  %v1746_v14 = vpop.xlane.xlu0 %1745 }
 0xd94   :  { %v1748_v1 = vsel %vm1075_vm1, %v1746_v14, -1e+30 }
 0xd95   :  { %v1697_v16 = vmul.f32 1.442695, %v1694_v7  ;;  %v1703_v3 = vmul.f32 1.442695, %v1700_v9  ;;  %v1750_v20 = vmax.f32 %v1692_v11, %v1748_v1 }
 0xd97   :  { %2205 = vpow2.f32 %v1697_v16  ;;  %v1752_v35 = vsub.f32 %v1692_v11, %v1750_v20  ;;  %v1758_v36 = vsub.f32 %v1748_v1, %v1750_v20  ;;  %v1201_v50 = vpop.permute.xlu0 %1200 }
 0xd98   :  { %2207 = vpow2.f32 %v1703_v3  ;;  %v1205_v14 = vmul.f32 %v2803_v53, %v1201_v50 }
 0xd99   :  { %2209 = vpow2.f32 %v1701_v51  ;;  %v1755_v30 = vmul.f32 1.442695, %v1752_v35  ;;  %v1204_v51 = vmul.f32 %v2820_v19, %v1199_v34 }
 0xd9a   :  { %2211 = vpow2.f32 %v1695_v28 }
 0xd9b   :  { %v2198_v22 = vpop.eup %2197  ;;  %2213 = vpow2.f32 %v1755_v30  ;;  %v1234_v61 = vpop.permute.xlu0 %1233 }
 0xd9c   :  { %v2200_v40 = vpop.eup %2199  ;;  %v1672_v32 = vmul.f32 0.0, %v2198_v22 }
 0xd9d   :  { %v2202_v45 = vpop.eup %2201  ;;  %v1676_v39 = vmul.f32 %v2200_v40, %v2774_v49 }
 0xd9e   :  { %v2204_v47 = vpop.eup %2203  ;;  %v1671_v57 = vmul.f32 0.0, %v2202_v45  ;;  %v1674_v21 = vadd.f32 %v2200_v40, %v1672_v32 }
 0xd9f   :  { %v2833_v59 = vadd.f32 %v1676_v39, %v1672_v32  ;;  %v1675_v52 = vmul.f32 %v2204_v47, %v2777_v23  ;;  %v1761_v23 = vmul.f32 1.442695, %v1758_v36  ;;  %v1325_v35 = vpop.permute.xlu0 %1324 }
 0xda0   :  { %v1673_v22 = vadd.f32 %v2204_v47, %v1671_v57 }
 0xda1   :  { %v2836_v29 = vadd.f32 %v1675_v52, %v1671_v57  ;;  %2215 = vpow2.f32 %v1761_v23 }
 0xda4   :  { %v2206_v56 = vpop.eup %2205 }
 0xda5   :  { %v2208_v62 = vpop.eup %2207  ;;  %1718 = vperm.xlu1 %2156, %v2206_v56   ;;  %v1708_v6 = vmul.f32 %v2206_v56, %v1674_v21 }
 0xda6   :  { %v1706_v8 = vsel %vm569_vm15, %v2208_v62, 0.0  ;;  %v2210_v46 = vpop.eup %2209 }
 0xda7   :  { %1730 = vperm.xlu0 %2155, %v1706_v8   ;;  %v2212_v5 = vpop.eup %2211  ;;  %v1705_v49 = vsel %vm569_vm15, %v2210_v46, 0.0  ;;  %v1710_v10 = vadd.f32 %v1708_v6, %v1706_v8 }
 0xda8   :  { %v2214_v55 = vpop.eup %2213  ;;  %v1707_v52 = vmul.f32 %v2212_v5, %v1673_v22 }
 0xda9   :  { %1713 = vperm.xlu1 %2156, %v2212_v5   ;;  %v1766_v20 = vmul.f32 %v2214_v55, %v1710_v10 }
 0xdaa   :  { %v1709_v46 = vadd.f32 %v1707_v52, %v1705_v49 }
 0xdab   :  { %1725 = vperm.xlu0 %2155, %v1705_v49  }
 0xdad   :  { %1776 = vperm.xlu1 %2156, %v2214_v55  }
 0xdae   :  { %v2216_v1 = vpop.eup %2215 }
 0xdbe   :  { %v1743_v41 = vpop.xlane.xlu1 %1742 }
 0xdbf   :  { %v1747_v43 = vsel %vm1075_vm1, %v1743_v41, -1e+30 }
 0xdc0   :  { %v1749_v37 = vmax.f32 %v1691_v2, %v1747_v43 }
 0xdc2   :  { %v1751_v31 = vsub.f32 %v1691_v2, %v1749_v37  ;;  %v1757_v44 = vsub.f32 %v1747_v43, %v1749_v37  ;;  %v1207_v11 = vpop.permute.xlu1 %1206  ;;  %v1764_v2 = vsel %vm1075_vm1, %v2216_v1, 0.0  ;;  %v1515_v43 = vsel %vm1513_vm5, 1.0, %v2242_v38 }
 0xdc3   :  { %v1212_v40 = vadd.f32 %v1207_v11, %v1204_v51  ;;  %v1768_v45 = vadd.f32 %v1766_v20, %v1764_v2 }
 0xdc4   :  { %v1753_v7 = vmul.f32 1.442695, %v1751_v31  ;;  %v1759_v9 = vmul.f32 1.442695, %v1757_v44  ;;  %v1514_v44 = vsel %vm1512_vm6, 1.0, %v2242_v38 }
 0xdc6   :  { %2217 = vpow2.f32 %v1753_v7  ;;  %v1209_v16 = vpop.permute.xlu1 %1208 }
 0xdc7   :  { %2219 = vpow2.f32 %v1759_v9  ;;  %v1213_v3 = vadd.f32 %v1209_v16, %v1205_v14 }
 0xdc8   :  { %2221 = vrcp.f32 %v1768_v45 }
 0xdc9   :  { %v1238_v28 = vadd.f32 %v1234_v61, %v1213_v3 }
 0xdca   :  { %v1232_v30 = vpop.permute.xlu1 %1231 }
 0xdcb   :  { %v1329_v32 = vadd.f32 %v1325_v35, %v1238_v28  ;;  %v1237_v39 = vadd.f32 %v1232_v30, %v1212_v40  ;;  %v1051_v30 = vsel %vm569_vm15, %v2702_v12, %v2557_v4 }
 0xdcd   :  { %v1331_v53 = vadd.f32 %v1329_v32, %v2543_v27 }
 0xdce   :  { %v1323_v56 = vpop.permute.xlu1 %1322 }
 0xdcf   :  { %v1934_v62 = vmul.f32 -1.442695, %v1331_v53  ;;  %v1328_v8 = vadd.f32 %v1323_v56, %v1237_v39 }
 0xdd1   :  { %2223 = vpow2.f32 %v1934_v62  ;;  %v1330_v19 = vadd.f32 %v1328_v8, %v2540_v17 }
 0xdd3   :  { %v2218_v55 = vpop.eup %2217  ;;  %v1933_v36 = vmul.f32 -1.442695, %v1330_v19 }
 0xdd4   :  { %v2220_v23 = vpop.eup %2219  ;;  %1771 = vperm.xlu1 %2156, %v2218_v55   ;;  %v1765_v47 = vmul.f32 %v2218_v55, %v1709_v46 }
 0xdd5   :  { %2225 = vpow2.f32 %v1933_v36  ;;  %v1763_v57 = vsel %vm1075_vm1, %v2220_v23, 0.0  ;;  %v2222_v5 = vpop.eup %2221 }
 0xdd6   :  { %v1767_v27 = vadd.f32 %v1765_v47, %v1763_v57  ;;  %1783 = vperm.xlu0 %2155, %v1763_v57  }
 0xdd8   :  { %2227 = vrcp.f32 %v1767_v27 }
 0xdda   :  { %1788 = vperm.xlu0 %2155, %v1764_v2  }
 0xdde   :  { %v2224_v34 = vpop.eup %2223  ;;  %1804 = vperm.xlu0 %2155, %v2222_v5  }
 0xddf   :  { %v1339_v50 = vadd.f32 1.0, %v2224_v34 }
 0xde1   :  { %2229 = vrcp.f32 %v1339_v50 }
 0xde2   :  { %v2226_v17 = vpop.eup %2225 }
 0xde3   :  { %v1338_v49 = vadd.f32 1.0, %v2226_v17 }
 0xde5   :  { %v2228_v21 = vpop.eup %2227  ;;  %2231 = vrcp.f32 %v1338_v49 }
 0xde6   :  { %1799 = vperm.xlu1 %2156, %v2228_v21  }
 0xdee   :  { %v2230_v41 = vpop.eup %2229 }
 0xdef   :  { %v1517_v6 = vmul.f32 %v2230_v41, %v1515_v43 }
 0xdf1   :  { %v1519_v37 = vadd.f32 %v1517_v6, %v2720_v24 }
 0xdf2   :  { %v2232_v31 = vpop.eup %2231 }
 0xdf3   :  { %v1516_v11 = vmul.f32 %v2232_v31, %v1514_v44  ;;  %vm1521_vm7 = vcmp.gt.f32.partialorder %v1519_v37, 0.99  ;;  %vm1525_vm8 = vcmp.le.f32.partialorder %v1519_v37, 0.99 }
 0xdf4   :  { %v1527_v61 = vsel %vm1525_vm8, %v1515_v43, 0.0  ;;  %v1523_v14 = vsel %vm1521_vm7, %v1515_v43, 0.0 }
 0xdf5   :  { %v1518_v10 = vadd.f32 %v1516_v11, %v2707_v13  ;;  %v1529_v7 = vmul.f32 %v2230_v41, %v1527_v61  ;;  %v1539_v9 = vadd.f32 %v1527_v61, %v2715_v63 }
 0xdf7   :  { %vm1524_vm9 = vcmp.le.f32.partialorder %v1518_v10, 0.99  ;;  %vm1520_vm10 = vcmp.gt.f32.partialorder %v1518_v10, 0.99  ;;  %v1531_v1 = vadd.f32 %v1529_v7, %v2720_v24  ;;  %v1541_v16 = vadd.f32 %v1539_v9, %v1523_v14 }
 0xdf8   :  { %v1526_v3 = vsel %vm1524_vm9, %v1514_v44, 0.0  ;;  %v1522_v28 = vsel %vm1520_vm10, %v1514_v44, 0.0 }
 0xdf9   :  { %v1528_v20 = vmul.f32 %v2232_v31, %v1526_v3  ;;  %v1533_v51 = vsub.f32 1.0, %v1531_v1  ;;  %v1538_v38 = vadd.f32 %v1526_v3, %v2699_v25  ;;  %v1553_v53 = vsel %vm1075_vm1, %v1541_v16, %v2715_v63 }
 0xdfb   :  { %v1530_v2 = vadd.f32 %v1528_v20, %v2707_v13  ;;  %v1535_v35 = vmul.f32 %v1533_v51, %v1523_v14  ;;  %v1540_v22 = vadd.f32 %v1538_v38, %v1522_v28  ;;  %v1050_v13 = vsel %vm569_vm15, %v2692_v42, %v2548_v58 }
 0xdfc   :  { %vm1825_vm15 = vcmask 785408  }
 0xdfd   :  { %v1532_v40 = vsub.f32 1.0, %v1530_v2  ;;  %v1537_v32 = vadd.f32 %v1535_v35, %v1051_v30  ;;  %v1552_v12 = vsel %vm1075_vm1, %v1540_v22, %v2699_v25 }
 0xdff   :  { %v1534_v45 = vmul.f32 %v1532_v40, %v1522_v28  ;;  %v1551_v24 = vsel %vm1075_vm1, %v1537_v32, %v1051_v30 }
 0xe00   :  { %v1858_v39 = vadd.f32 %v1553_v53, %v1551_v24  ;;  %v1872_v62 = vsel %vm559_vm13, %v1551_v24, 0.0 }
 0xe01   :  { %v1536_v52 = vadd.f32 %v1534_v45, %v1050_v13 }
 0xe02   :  { %v1860_v18 = vsel %vm559_vm13, %v1858_v39, 0.0 }
 0xe03   :  { %v1550_v4 = vsel %vm1075_vm1, %v1536_v52, %v1050_v13 }
 0xe04   :  { %v1871_v56 = vsel %vm559_vm13, %v1550_v4, 0.0  ;;  %v1857_v8 = vadd.f32 %v1552_v12, %v1550_v4 }
 0xe05   :  { %v1873_v63 = vadd.f32 %v1872_v62, %v1871_v56 }
 0xe06   :  { %v1859_v19 = vsel %vm559_vm13, %v1857_v8, 0.0  ;;  %vm1823_vm13 = vcmask 523264  }
 0xe07   :  { %v1874_v58 = vrot.slane %v1873_v63, 4  ;;  %v1861_v42 = vadd.f32 %v1860_v18, %v1859_v19 }
 0xe09   :  { %v1875_v46 = vadd.f32 %v1874_v58, %v1873_v63  ;;  %v1862_v17 = vrot.slane %v1861_v42, 4 }
 0xe0b   :  { %v1876_v55 = vrot.slane %v1875_v46, 2  ;;  %v1863_v6 = vadd.f32 %v1862_v17, %v1861_v42 }
 0xe0d   :  { %v1877_v36 = vadd.f32 %v1876_v55, %v1875_v46  ;;  %v1864_v10 = vrot.slane %v1863_v6, 2  ;;  %v1885_v55 = vand.u32 127, %v45_v0 }
 0xe0f   :  { %v1878_v23 = vrot.slane %v1877_v36, 1  ;;  %v1865_v16 = vadd.f32 %v1864_v10, %v1863_v6  ;;  %vm1886_vm14 = vcmp.eq.s32.totalorder %v1885_v55, 0 }
 0xe11   :  { %v1879_v47 = vadd.f32 %v1878_v23, %v1877_v36 }
 0xe13   :  { %v1881_v57 = vmul.f32 0.0625, %v1879_v47 }
 0xe15   :  { %v1882_v25 = vadd.f32 %v1881_v57, %v2739_v48 }
 0xe17   :  { %v1883_v33 = vmul.f32 -0.001, %v1882_v25 }
 0xe19   :  { %1890 = vperm.xlu0 %2155, %v1883_v33  }
 0xe20   :  { %v1719_v27 = vpop.permute.xlu1 %1718 }
 0xe21   :  { %v1722_v49 = vmul.f32 %v1719_v27, %v2833_v59 }
 0xe22   :  { %v1731_v5 = vpop.permute.xlu0 %1730 }
 0xe23   :  { %v1734_v21 = vmul.f32 %v1731_v5, %v2785_v15 }
 0xe24   :  { %v1714_v34 = vpop.permute.xlu1 %1713 }
 0xe25   :  { %v1736_v37 = vadd.f32 %v1734_v21, %v1722_v49  ;;  %v1721_v44 = vmul.f32 %v1714_v34, %v2836_v29  ;;  %v1866_v29 = vrot.slane %v1865_v16, 1 }
 0xe26   :  { %v1726_v50 = vpop.permute.xlu0 %1725 }
 0xe27   :  { %v1733_v48 = vmul.f32 %v1726_v50, %v2779_v60  ;;  %v1867_v35 = vadd.f32 %v1866_v29, %v1865_v16 }
 0xe28   :  { %v1777_v43 = vpop.permute.xlu1 %1776 }
 0xe29   :  { %v1780_v11 = vmul.f32 %v1777_v43, %v1736_v37  ;;  %v1735_v1 = vadd.f32 %v1733_v48, %v1721_v44  ;;  %v1868_v40 = vmul.f32 0.001, %v1867_v35 }
 0xe4f   :  { %v1772_v9 = vpop.permute.xlu1 %1771 }
 0xe50   :  { %v1779_v15 = vmul.f32 %v1772_v9, %v1735_v1 }
 0xe51   :  { %v1784_v41 = vpop.permute.xlu0 %1783 }
 0xe52   :  { %v1791_v3 = vmul.f32 %v1784_v41, %v2809_v54  ;;  %v1870_v54 = vmul.f32 0.25, %v1868_v40 }
 0xe54   :  { %v1793_v60 = vadd.f32 %v1791_v3, %v1779_v15 }
 0xe55   :  { %v1789_v31 = vpop.permute.xlu0 %1788 }
 0xe56   :  { %v1792_v61 = vmul.f32 %v1789_v31, %v2789_v26 }
 0xe58   :  { %v1794_v7 = vadd.f32 %v1792_v61, %v1780_v11 }
 0xe59   :  { %v1805_v14 = vpop.permute.xlu0 %1804 }
 0xe5a   :  { %v1808_v59 = vmul.f32 %v1805_v14, %v1794_v7 }
 0xe5c   :  { %v1832_v20 = vrot.slane %v1808_v59, 2  ;;  %v1828_v51 = vrot.slane %v1808_v59, 1  ;;  %v1836_v22 = vrot.slane %v1808_v59, 3 }
 0xe5e   :  { %1833 = vrot.lane.b32.xlu0 %v1832_v20, %s2244_s3  ;;  %1829 = vrot.lane.b32.xlu1 %v1828_v51, %s2245_s16 }
 0xe61   :  { %v1800_v38 = vpop.permute.xlu1 %1799 }
 0xe62   :  { %v1807_v26 = vmul.f32 %v1800_v38, %v1793_v60 }
 0xe64   :  { %v1814_v28 = vrot.slane %v1807_v26, 2  ;;  %v1810_v2 = vrot.slane %v1807_v26, 1  ;;  %v1818_v30 = vrot.slane %v1807_v26, 3 }
 0xe66   :  { %1815 = vrot.lane.b32.xlu0 %v1814_v28, %s2244_s3  ;;  %1811 = vrot.lane.b32.xlu1 %v1810_v2, %s2245_s16 }
 0xe6a   :  { %1837 = vrot.lane.b32.xlu0 %v1836_v22, %s2246_s17  ;;  %1819 = vrot.lane.b32.xlu1 %v1818_v30, %s2246_s17 }
 0xe6e   :  { %1896 = vperm.xlu1 %2156, %v1870_v54  }
 0xe94   :  { %v1891_v32 = vpop.permute.xlu0 %1890 }
 0xed0   :  { %v1830_v45 = vpop.permute.xlu1 %1829  ;;  %v1834_v24 = vpop.permute.xlu0 %1833 }
 0xed1   :  { %v1840_v39 = vsel %vm51_vm0, %v1808_v59, %v1830_v45 }
 0xed2   :  { %v1841_v4 = vsel %vm1823_vm13, %v1840_v39, %v1834_v24 }
 0xed8   :  { %v1812_v53 = vpop.permute.xlu1 %1811  ;;  %v1816_v13 = vpop.permute.xlu0 %1815 }
 0xed9   :  { %v1822_v52 = vsel %vm51_vm0, %v1807_v26, %v1812_v53  ;;  %vm1887_vm0 = vcmp.eq.s32.totalorder %v1885_v55, 1 }
 0xeda   :  { %v1824_v12 = vsel %vm1823_vm13, %v1822_v52, %v1816_v13  ;;  %v1893_v23 = vsel %vm1887_vm0, %v1891_v32, 0.0 }
 0xedc   :  { %v1820_v56 = vpop.permute.xlu1 %1819  ;;  %v1838_v62 = vpop.permute.xlu0 %1837 }
 0xedd   :  { %v1826_v8 = vsel %vm1825_vm15, %v1824_v12, %v1820_v56  ;;  %v1842_v63 = vsel %vm1825_vm15, %v1841_v4, %v1838_v62 }
 0xede   :  { %v1844_v19 = vrot.slane %v1826_v8, 3  ;;  %v1847_v18 = vrot.slane %v1842_v63, 6  ;;  %v1849_v42 = vrot.slane %v1842_v63, 1 }
 0xee0   :  { %v1851_v58 = vsel %vm164_vm2, %v1826_v8, %v1844_v19 }
 0xee1   :  { %v1853_v46 = vsel %vm1852_vm11, %v1851_v58, %v1847_v18 }
 0xee2   :  { %v1855_v36 = vsel %vm1854_vm12, %v1853_v46, %v1849_v42 }
 0xee3   :  { %1856 = vst [vmem:[%s2905_s4] sm:$0xf] %v1855_v36 }
 0xee9   :  { %v1897_v47 = vpop.permute.xlu1 %1896 }
 0xeea   :  { %v1899_v57 = vsel %vm1886_vm14, %v1897_v47, %v1893_v23 }
 0xeeb   :  { %1900 = vst [vmem:[%s2906_s5] sm:$0x1] %v1899_v57 }

</bundles_post_ra>
